<compile_context>
chip_gen: v6e
topology: v6e:2x2x1
jax: 0.10.0
libtpu: 0.0.40
codegen_flags: <defaults>
</compile_context>

<pallas_src>
import functools

import jax
import jax.numpy as jnp
from jax import lax
from jax.experimental import pallas as pl
from jax.experimental.pallas import tpu as pltpu

SEQ_LEN = 47
VOCAB = 5


def position_encoding(n_pos, d_model):
    """Standard sinusoidal position encoding, shape [n_pos, d_model]."""
    pos = jnp.arange(n_pos, dtype=jnp.float32)[:, None]
    i = jnp.arange(d_model, dtype=jnp.float32)[None, :]
    angle_rates = 1.0 / jnp.power(10000.0, (2.0 * jnp.floor(i / 2.0)) / d_model)
    angles = pos * angle_rates
    pe = jnp.where((jnp.arange(d_model) % 2) == 0, jnp.sin(angles), jnp.cos(angles))
    return pe.astype(jnp.float32)


def _sigmoid(x):
    return 1.0 / (1.0 + jnp.exp(-x))


def make_lstmpe_kernel(num_layers, hidden_dim):
    H = hidden_dim
    G = 4 * H

    def kernel(*refs):
        # ---- unpack refs -------------------------------------------------
        idx = 0
        ids_ref, seg_ref, e0_ref, p0b_ref, s0_ref, whh0_ref = refs[idx:idx + 6]
        idx += 6
        deep = []
        for _ in range(num_layers - 1):
            deep.append(refs[idx:idx + 3])          # (w_ih, w_hh, bias)
            idx += 3
        wfc1_ref, bfc1_ref, wfc2_ref, bfc2_ref = refs[idx:idx + 4]
        idx += 4
        out_ref = refs[idx]
        pre_ref, hseq_ref = refs[idx + 1:idx + 3]   # VMEM scratch

        S, Bt = ids_ref.shape

        # ---- layer-0 input preactivations for ALL timesteps (folded) -----
        # pre[t,b,:] = E0[id[t,b]] + (pos_t @ Wih0 + b_ih0 + b_hh0) + seg[t,b]*colsum(Wih0)
        ids = ids_ref[...]                                       # [S, Bt] int32
        seg = seg_ref[...]                                       # [S, Bt] f32
        pre = (p0b_ref[...][:, None, :]                          # [S, 1, G]
               + seg[:, :, None] * s0_ref[...][None, :, :])      # -> [S, Bt, G]
        e0 = e0_ref[...]                                         # [VOCAB, G]
        ids3 = ids[:, :, None]
        for v in range(VOCAB):   # 5 VPU selects instead of a K=5 MXU matmul
            pre = pre + jnp.where(ids3 == v, e0[v:v + 1, :][None, :, :], 0.0)
        pre_ref[...] = pre

        zeros = jnp.zeros((Bt, H), jnp.float32)

        def gates(g, c):
            i = _sigmoid(g[:, 0:H])
            f = _sigmoid(g[:, H:2 * H])
            gc = jnp.tanh(g[:, 2 * H:3 * H])
            o = _sigmoid(g[:, 3 * H:4 * H])
            c_new = f * c + i * gc
            h_new = o * jnp.tanh(c_new)
            return h_new, c_new

        # ---- layer 0 recurrence (input GEMM already folded into pre_ref) --
        whh0 = whh0_ref[...]

        def step0(t, carry):
            h, c = carry
            g = pre_ref[t] + jnp.dot(h, whh0, preferred_element_type=jnp.float32)
            h, c = gates(g, c)
            hseq_ref[t] = h
            return (h, c)

        h_last, _ = lax.fori_loop(0, S, step0, (zeros, zeros))

        # ---- layers 1 .. L-1 ----------------------------------------------
        for (wih_ref, whh_ref, b_ref) in deep:
            wih = wih_ref[...]
            whh = whh_ref[...]
            b = b_ref[...]

            def step(t, carry, wih=wih, whh=whh, b=b):
                h, c = carry
                x = hseq_ref[t]                      # prev layer output at t
                g = (jnp.dot(x, wih, preferred_element_type=jnp.float32)
                     + jnp.dot(h, whh, preferred_element_type=jnp.float32) + b)
                h, c = gates(g, c)
                hseq_ref[t] = h                      # overwrite in place
                return (h, c)

            h_last, _ = lax.fori_loop(0, S, step, (zeros, zeros))

        # ---- FC head on out[-1] == h_{T-1} of the last layer ---------------
        h1 = jnp.dot(h_last, wfc1_ref[...],
                     preferred_element_type=jnp.float32) + bfc1_ref[...]
        h1 = jnp.maximum(h1, 0.0)                    # ReLU; Dropout = identity
        # final [H2, 1] linear as VPU multiply + lane reduction (avoid N=1 MXU)
        out = jnp.sum(h1 * wfc2_ref[...], axis=-1, keepdims=True) + bfc2_ref[...]
        out_ref[...] = out.astype(out_ref.dtype)

    return kernel


@jax.jit
def lstmpe_forward(enc_input, params):
    """enc_input: [B, 2, 47] float32 -> [B, 1] float32."""
    B = enc_input.shape[0]
    ids_sb = enc_input[:, 0, :].astype(jnp.int32).T      # [S, B]  (glue)
    seg_sb = enc_input[:, 1, :].astype(jnp.float32).T    # [S, B]

    emb, pos = params["emb"], params["pos"]
    w_ih, w_hh = params["w_ih"], params["w_hh"]
    b_ih, b_hh = params["b_ih"], params["b_hh"]
    num_layers = len(w_hh)
    S, D = pos.shape
    H = w_hh[0].shape[0]
    G = 4 * H
    hp = jax.lax.Precision.HIGHEST

    # --- weight-only algebraic fold of layer 0's input transform ----------
    e0 = jnp.dot(emb, w_ih[0], precision=hp)                        # [V, 4H]
    p0b = jnp.dot(pos, w_ih[0], precision=hp) + b_ih[0] + b_hh[0]   # [S, 4H]
    s0 = jnp.sum(w_ih[0], axis=0, keepdims=True)                    # [1, 4H]

    inputs = [ids_sb, seg_sb, e0, p0b, s0, w_hh[0]]
    for l in range(1, num_layers):
        inputs += [w_ih[l], w_hh[l], (b_ih[l] + b_hh[l]).reshape(1, G)]
    inputs += [params["w_fc1"], params["b_fc1"].reshape(1, -1),
               params["w_fc2"].reshape(1, -1), params["b_fc2"].reshape(1, 1)]

    bt = B if B <= 128 else 128
    assert B % bt == 0, "batch must divide the batch tile"
    grid = (B // bt,)

    def weight_spec(a):                          # full array, resident every step
        return pl.BlockSpec(a.shape, lambda i: (0, 0))

    in_specs = [
        pl.BlockSpec((S, bt), lambda i: (0, i)),     # ids (batch on lanes)
        pl.BlockSpec((S, bt), lambda i: (0, i)),     # seg
    ] + [weight_spec(a) for a in inputs[2:]]
    out_specs = pl.BlockSpec((bt, 1), lambda i: (i, 0))

    kernel = make_lstmpe_kernel(num_layers, H)

    return pl.pallas_call(
        kernel,
        out_shape=jax.ShapeDtypeStruct((B, 1), jnp.float32),
        grid=grid,
        in_specs=in_specs,
        out_specs=out_specs,
        scratch_shapes=[pltpu.VMEM((S, bt, G), jnp.float32),   # layer-0 preacts
                        pltpu.VMEM((S, bt, H), jnp.float32)],  # hidden sequence
        compiler_params=pltpu.CompilerParams(
            dimension_semantics=("parallel",)),
    )(*inputs)


def init_params(key, d_model, hidden_dim, num_layers, hidden_dim2):
    H = hidden_dim
    keys = iter(jax.random.split(key, 4 * num_layers + 8))

    def u(shape, bound):
        return jax.random.uniform(next(keys), shape, jnp.float32, -bound, bound)

    params = {
        "emb": 0.1 * jax.random.normal(next(keys), (VOCAB, d_model), jnp.float32),
        "pos": position_encoding(SEQ_LEN, d_model),
        "w_ih": [], "w_hh": [], "b_ih": [], "b_hh": [],
    }
    k = 1.0 / (H ** 0.5)
    for l in range(num_layers):
        in_dim = d_model if l == 0 else H
        # PyTorch stores [4H, in]; we store pre-transposed [in, 4H], gate order i,f,g,o.
        params["w_ih"].append(u((in_dim, 4 * H), k))
        params["w_hh"].append(u((H, 4 * H), k))
        params["b_ih"].append(u((4 * H,), k))
        params["b_hh"].append(u((4 * H,), k))
    params["w_fc1"] = u((H, hidden_dim2), k)           # [in, out]
    params["b_fc1"] = u((hidden_dim2,), k)
    k2 = 1.0 / (hidden_dim2 ** 0.5)
    params["w_fc2"] = u((hidden_dim2,), k2)            # final linear weight row
    params["b_fc2"] = u((1,), k2)
    return params


def reference_forward(enc_input, params):
    """Pure-JAX reference mirroring the PyTorch forward (inference mode)."""
    ids = enc_input[:, 0, :].astype(jnp.int32)
    seg = enc_input[:, 1, :].astype(jnp.float32)
    x = jnp.take(params["emb"], ids, axis=0) + params["pos"][None] + seg[:, :, None]
    xs = jnp.transpose(x, (1, 0, 2))                   # [S, B, D]
    B = xs.shape[1]
    H = params["w_hh"][0].shape[0]
    hp = jax.lax.Precision.HIGHEST

    def run_layer(seq, w_ih, w_hh, b):
        def step(carry, x_t):
            h, c = carry
            g = (jnp.dot(x_t, w_ih, precision=hp)
                 + jnp.dot(h, w_hh, precision=hp) + b)
            i = _sigmoid(g[:, 0:H])
            f = _sigmoid(g[:, H:2 * H])
            gc = jnp.tanh(g[:, 2 * H:3 * H])
            o = _sigmoid(g[:, 3 * H:4 * H])
            c = f * c + i * gc
            h = o * jnp.tanh(c)
            return (h, c), h
        init = (jnp.zeros((B, H), jnp.float32), jnp.zeros((B, H), jnp.float32))
        _, hs = lax.scan(step, init, seq)
        return hs

    hs = xs
    for l in range(len(params["w_hh"])):
        b = params["b_ih"][l] + params["b_hh"][l]
        hs = run_layer(hs, params["w_ih"][l], params["w_hh"][l], b)
    h_last = hs[-1]                                    # out[-1]
    h1 = jnp.maximum(jnp.dot(h_last, params["w_fc1"], precision=hp)
                     + params["b_fc1"], 0.0)
    return jnp.dot(h1, params["w_fc2"][:, None], precision=hp) + params["b_fc2"]


if __name__ == "__main__":
    B, d_model, hidden_dim, num_layers, hidden_dim2 = 2, 32, 32, 2, 32
    key = jax.random.PRNGKey(0)
    k_ids, k_seg, k_par = jax.random.split(key, 3)

    # enc_input [B, 2, 47]: channel 0 = token ids (as floats), channel 1 = segment values.
    ids = jax.random.randint(k_ids, (B, SEQ_LEN), 0, VOCAB).astype(jnp.float32)
    seg = jax.random.uniform(k_seg, (B, SEQ_LEN), jnp.float32)
    enc_input = jnp.stack([ids, seg], axis=1)

    params = init_params(k_par, d_model, hidden_dim, num_layers, hidden_dim2)

    out = lstmpe_forward(enc_input, params)
    out = jax.block_until_ready(out)

    ref = reference_forward(enc_input, params)
    assert out.shape == (B, 1)
    assert jnp.allclose(out, ref, rtol=2e-3, atol=2e-3), (out, ref)

    print("KERNEL_OK")
</pallas_src>

<mosaic_0001>
module attributes {stable_mosaic.version = 11 : i64} {
  func.func @kernel(%arg0: i32, %arg1: memref<47x2xi32, #tpu.memory_space<vmem>>, %arg2: memref<47x2xf32, #tpu.memory_space<vmem>>, %arg3: memref<5x128xf32, #tpu.memory_space<vmem>>, %arg4: memref<47x128xf32, #tpu.memory_space<vmem>>, %arg5: memref<1x128xf32, #tpu.memory_space<vmem>>, %arg6: memref<32x128xf32, #tpu.memory_space<vmem>>, %arg7: memref<32x128xf32, #tpu.memory_space<vmem>>, %arg8: memref<32x128xf32, #tpu.memory_space<vmem>>, %arg9: memref<1x128xf32, #tpu.memory_space<vmem>>, %arg10: memref<32x32xf32, #tpu.memory_space<vmem>>, %arg11: memref<1x32xf32, #tpu.memory_space<vmem>>, %arg12: memref<1x32xf32, #tpu.memory_space<vmem>>, %arg13: memref<1x1xf32, #tpu.memory_space<vmem>>, %arg14: memref<2x1xf32, #tpu.memory_space<vmem>>, %arg15: memref<47x2x128xf32, #tpu.memory_space<vmem>>, %arg16: memref<47x2x32xf32, #tpu.memory_space<vmem>>) attributes {dimension_semantics = [#tpu.dimension_semantics<parallel>], iteration_bounds = array<i64: 1>, scalar_prefetch = 0 : i64, scratch_operands = 2 : i64, tpu.core_type = #tpu.core_type<tc>, window_params = [{transform_indices = @transform_0, window_bounds = array<i64: 47, 2>}, {transform_indices = @transform_1, window_bounds = array<i64: 47, 2>}, {pipeline_mode = #tpu.pipeline_mode<synchronous>, transform_indices = @transform_2, window_bounds = array<i64: 5, 128>}, {pipeline_mode = #tpu.pipeline_mode<synchronous>, transform_indices = @transform_3, window_bounds = array<i64: 47, 128>}, {pipeline_mode = #tpu.pipeline_mode<synchronous>, transform_indices = @transform_4, window_bounds = array<i64: 1, 128>}, {pipeline_mode = #tpu.pipeline_mode<synchronous>, transform_indices = @transform_5, window_bounds = array<i64: 32, 128>}, {pipeline_mode = #tpu.pipeline_mode<synchronous>, transform_indices = @transform_6, window_bounds = array<i64: 32, 128>}, {pipeline_mode = #tpu.pipeline_mode<synchronous>, transform_indices = @transform_7, window_bounds = array<i64: 32, 128>}, {pipeline_mode = #tpu.pipeline_mode<synchronous>, transform_indices = @transform_8, window_bounds = array<i64: 1, 128>}, {pipeline_mode = #tpu.pipeline_mode<synchronous>, transform_indices = @transform_9, window_bounds = array<i64: 32, 32>}, {pipeline_mode = #tpu.pipeline_mode<synchronous>, transform_indices = @transform_10, window_bounds = array<i64: 1, 32>}, {pipeline_mode = #tpu.pipeline_mode<synchronous>, transform_indices = @transform_11, window_bounds = array<i64: 1, 32>}, {pipeline_mode = #tpu.pipeline_mode<synchronous>, transform_indices = @transform_12, window_bounds = array<i64: 1, 1>}, {transform_indices = @transform_13, window_bounds = array<i64: 2, 1>}]} {
    %c0 = arith.constant 0 : index
    %c0_0 = arith.constant 0 : index
    %0 = vector.load %arg1[%c0, %c0_0] : memref<47x2xi32, #tpu.memory_space<vmem>>, vector<47x2xi32>
    %c0_1 = arith.constant 0 : index
    %c0_2 = arith.constant 0 : index
    %1 = vector.load %arg2[%c0_1, %c0_2] : memref<47x2xf32, #tpu.memory_space<vmem>>, vector<47x2xf32>
    %c0_3 = arith.constant 0 : index
    %c0_4 = arith.constant 0 : index
    %2 = vector.load %arg4[%c0_3, %c0_4] : memref<47x128xf32, #tpu.memory_space<vmem>>, vector<47x128xf32>
    %3 = vector.shape_cast %2 : vector<47x128xf32> to vector<47x1x128xf32>
    %4 = vector.shape_cast %1 : vector<47x2xf32> to vector<47x2x1xf32>
    %c0_5 = arith.constant 0 : index
    %c0_6 = arith.constant 0 : index
    %5 = vector.load %arg5[%c0_5, %c0_6] : memref<1x128xf32, #tpu.memory_space<vmem>>, vector<1x128xf32>
    %6 = vector.shape_cast %5 : vector<1x128xf32> to vector<1x1x128xf32>
    %7 = vector.broadcast %4 : vector<47x2x1xf32> to vector<47x2x128xf32>
    %8 = vector.broadcast %6 : vector<1x1x128xf32> to vector<47x2x128xf32>
    %9 = arith.mulf %7, %8 : vector<47x2x128xf32>
    %10 = vector.broadcast %3 : vector<47x1x128xf32> to vector<47x2x128xf32>
    %11 = arith.addf %10, %9 : vector<47x2x128xf32>
    %c0_7 = arith.constant 0 : index
    %c0_8 = arith.constant 0 : index
    %12 = vector.load %arg3[%c0_7, %c0_8] : memref<5x128xf32, #tpu.memory_space<vmem>>, vector<5x128xf32>
    %13 = vector.shape_cast %0 : vector<47x2xi32> to vector<47x2x1xi32>
    %c0_i32 = arith.constant 0 : i32
    %14 = vector.broadcast %c0_i32 : i32 to vector<47x2x1xi32>
    %15 = arith.cmpi eq, %13, %14 : vector<47x2x1xi32>
    %16 = vector.extract_strided_slice %12 {offsets = [0, 0], sizes = [1, 128], strides = [1, 1]} : vector<5x128xf32> to vector<1x128xf32>
    %17 = vector.shape_cast %16 : vector<1x128xf32> to vector<1x1x128xf32>
    %cst = arith.constant 0.000000e+00 : f32
    %18 = vector.shape_cast %15 : vector<47x2x1xi1> to vector<47x2x1xi1>
    %19 = vector.broadcast %18 : vector<47x2x1xi1> to vector<47x2x128xi1>
    %20 = vector.shape_cast %17 : vector<1x1x128xf32> to vector<1x1x128xf32>
    %21 = vector.broadcast %20 : vector<1x1x128xf32> to vector<47x2x128xf32>
    %22 = vector.broadcast %cst : f32 to vector<47x2x128xf32>
    %23 = arith.select %19, %21, %22 : vector<47x2x128xi1>, vector<47x2x128xf32>
    %24 = arith.addf %11, %23 : vector<47x2x128xf32>
    %c1_i32 = arith.constant 1 : i32
    %25 = vector.broadcast %c1_i32 : i32 to vector<47x2x1xi32>
    %26 = arith.cmpi eq, %13, %25 : vector<47x2x1xi32>
    %27 = vector.extract_strided_slice %12 {offsets = [1, 0], sizes = [1, 128], strides = [1, 1]} : vector<5x128xf32> to vector<1x128xf32>
    %28 = vector.shape_cast %27 : vector<1x128xf32> to vector<1x1x128xf32>
    %cst_9 = arith.constant 0.000000e+00 : f32
    %29 = vector.shape_cast %26 : vector<47x2x1xi1> to vector<47x2x1xi1>
    %30 = vector.broadcast %29 : vector<47x2x1xi1> to vector<47x2x128xi1>
    %31 = vector.shape_cast %28 : vector<1x1x128xf32> to vector<1x1x128xf32>
    %32 = vector.broadcast %31 : vector<1x1x128xf32> to vector<47x2x128xf32>
    %33 = vector.broadcast %cst_9 : f32 to vector<47x2x128xf32>
    %34 = arith.select %30, %32, %33 : vector<47x2x128xi1>, vector<47x2x128xf32>
    %35 = arith.addf %24, %34 : vector<47x2x128xf32>
    %c2_i32 = arith.constant 2 : i32
    %36 = vector.broadcast %c2_i32 : i32 to vector<47x2x1xi32>
    %37 = arith.cmpi eq, %13, %36 : vector<47x2x1xi32>
    %38 = vector.extract_strided_slice %12 {offsets = [2, 0], sizes = [1, 128], strides = [1, 1]} : vector<5x128xf32> to vector<1x128xf32>
    %39 = vector.shape_cast %38 : vector<1x128xf32> to vector<1x1x128xf32>
    %cst_10 = arith.constant 0.000000e+00 : f32
    %40 = vector.shape_cast %37 : vector<47x2x1xi1> to vector<47x2x1xi1>
    %41 = vector.broadcast %40 : vector<47x2x1xi1> to vector<47x2x128xi1>
    %42 = vector.shape_cast %39 : vector<1x1x128xf32> to vector<1x1x128xf32>
    %43 = vector.broadcast %42 : vector<1x1x128xf32> to vector<47x2x128xf32>
    %44 = vector.broadcast %cst_10 : f32 to vector<47x2x128xf32>
    %45 = arith.select %41, %43, %44 : vector<47x2x128xi1>, vector<47x2x128xf32>
    %46 = arith.addf %35, %45 : vector<47x2x128xf32>
    %c3_i32 = arith.constant 3 : i32
    %47 = vector.broadcast %c3_i32 : i32 to vector<47x2x1xi32>
    %48 = arith.cmpi eq, %13, %47 : vector<47x2x1xi32>
    %49 = vector.extract_strided_slice %12 {offsets = [3, 0], sizes = [1, 128], strides = [1, 1]} : vector<5x128xf32> to vector<1x128xf32>
    %50 = vector.shape_cast %49 : vector<1x128xf32> to vector<1x1x128xf32>
    %cst_11 = arith.constant 0.000000e+00 : f32
    %51 = vector.shape_cast %48 : vector<47x2x1xi1> to vector<47x2x1xi1>
    %52 = vector.broadcast %51 : vector<47x2x1xi1> to vector<47x2x128xi1>
    %53 = vector.shape_cast %50 : vector<1x1x128xf32> to vector<1x1x128xf32>
    %54 = vector.broadcast %53 : vector<1x1x128xf32> to vector<47x2x128xf32>
    %55 = vector.broadcast %cst_11 : f32 to vector<47x2x128xf32>
    %56 = arith.select %52, %54, %55 : vector<47x2x128xi1>, vector<47x2x128xf32>
    %57 = arith.addf %46, %56 : vector<47x2x128xf32>
    %c4_i32 = arith.constant 4 : i32
    %58 = vector.broadcast %c4_i32 : i32 to vector<47x2x1xi32>
    %59 = arith.cmpi eq, %13, %58 : vector<47x2x1xi32>
    %60 = vector.extract_strided_slice %12 {offsets = [4, 0], sizes = [1, 128], strides = [1, 1]} : vector<5x128xf32> to vector<1x128xf32>
    %61 = vector.shape_cast %60 : vector<1x128xf32> to vector<1x1x128xf32>
    %cst_12 = arith.constant 0.000000e+00 : f32
    %62 = vector.shape_cast %59 : vector<47x2x1xi1> to vector<47x2x1xi1>
    %63 = vector.broadcast %62 : vector<47x2x1xi1> to vector<47x2x128xi1>
    %64 = vector.shape_cast %61 : vector<1x1x128xf32> to vector<1x1x128xf32>
    %65 = vector.broadcast %64 : vector<1x1x128xf32> to vector<47x2x128xf32>
    %66 = vector.broadcast %cst_12 : f32 to vector<47x2x128xf32>
    %67 = arith.select %63, %65, %66 : vector<47x2x128xi1>, vector<47x2x128xf32>
    %68 = arith.addf %57, %67 : vector<47x2x128xf32>
    %c0_13 = arith.constant 0 : index
    %c0_14 = arith.constant 0 : index
    %c0_15 = arith.constant 0 : index
    %69 = vector.load %arg15[%c0_13, %c0_14, %c0_15] : memref<47x2x128xf32, #tpu.memory_space<vmem>>, vector<47x2x128xf32>
    tpu.vector_store %arg15[%c0_13, %c0_14, %c0_15], %68 {strides = array<i32>} : memref<47x2x128xf32, #tpu.memory_space<vmem>>, vector<47x2x128xf32>,
    %cst_16 = arith.constant 0.000000e+00 : f32
    %70 = vector.broadcast %cst_16 : f32 to vector<2x32xf32>
    %c0_17 = arith.constant 0 : index
    %c0_18 = arith.constant 0 : index
    %71 = vector.load %arg6[%c0_17, %c0_18] : memref<32x128xf32, #tpu.memory_space<vmem>>, vector<32x128xf32>
    %c0_i32_19 = arith.constant 0 : i32
    %c47_i32 = arith.constant 47 : i32
    %72 = arith.addi %c0_i32_19, %c47_i32 : i32
    %c1_i32_20 = arith.constant 1 : i32
    %73:2 = scf.for %arg17 = %c0_i32_19 to %72 step %c1_i32_20 iter_args(%arg18 = %70, %arg19 = %70) -> (vector<2x32xf32>, vector<2x32xf32>)  : i32 {
      %95 = arith.index_cast %arg17 : i32 to index
      %c0_45 = arith.constant 0 : index
      %c0_46 = arith.constant 0 : index
      %96 = vector.load %arg15[%95, %c0_45, %c0_46] : memref<47x2x128xf32, #tpu.memory_space<vmem>>, vector<1x2x128xf32>
      %97 = vector.shape_cast %96 : vector<1x2x128xf32> to vector<2x128xf32>
      %cst_47 = arith.constant dense<0.000000e+00> : vector<2x128xf32>
      %98 = tpu.matmul %arg18, %71, %cst_47 {dimension_numbers = #tpu.dot_dimension_numbers<[1], [0], [0], [1], [0, 0, 1, 1], [], []>} : vector<2x32xf32>, vector<32x128xf32>, vector<2x128xf32> -> vector<2x128xf32>
      %99 = arith.addf %97, %98 : vector<2x128xf32>
      %100 = vector.extract_strided_slice %99 {offsets = [0, 0], sizes = [2, 32], strides = [1, 1]} : vector<2x128xf32> to vector<2x32xf32>
      %cst_48 = arith.constant 0.000000e+00 : f32
      %101 = vector.broadcast %cst_48 : f32 to vector<2x32xf32>
      %102 = arith.subf %101, %100 : vector<2x32xf32>
      %103 = math.exp %102 : vector<2x32xf32>
      %cst_49 = arith.constant 1.000000e+00 : f32
      %104 = vector.broadcast %cst_49 : f32 to vector<2x32xf32>
      %105 = arith.addf %104, %103 : vector<2x32xf32>
      %cst_50 = arith.constant 1.000000e+00 : f32
      %106 = vector.broadcast %cst_50 : f32 to vector<2x32xf32>
      %107 = arith.divf %106, %105 : vector<2x32xf32>
      %108 = vector.extract_strided_slice %99 {offsets = [0, 32], sizes = [2, 32], strides = [1, 1]} : vector<2x128xf32> to vector<2x32xf32>
      %cst_51 = arith.constant 0.000000e+00 : f32
      %109 = vector.broadcast %cst_51 : f32 to vector<2x32xf32>
      %110 = arith.subf %109, %108 : vector<2x32xf32>
      %111 = math.exp %110 : vector<2x32xf32>
      %cst_52 = arith.constant 1.000000e+00 : f32
      %112 = vector.broadcast %cst_52 : f32 to vector<2x32xf32>
      %113 = arith.addf %112, %111 : vector<2x32xf32>
      %cst_53 = arith.constant 1.000000e+00 : f32
      %114 = vector.broadcast %cst_53 : f32 to vector<2x32xf32>
      %115 = arith.divf %114, %113 : vector<2x32xf32>
      %116 = vector.extract_strided_slice %99 {offsets = [0, 64], sizes = [2, 32], strides = [1, 1]} : vector<2x128xf32> to vector<2x32xf32>
      %117 = math.tanh %116 : vector<2x32xf32>
      %118 = vector.extract_strided_slice %99 {offsets = [0, 96], sizes = [2, 32], strides = [1, 1]} : vector<2x128xf32> to vector<2x32xf32>
      %cst_54 = arith.constant 0.000000e+00 : f32
      %119 = vector.broadcast %cst_54 : f32 to vector<2x32xf32>
      %120 = arith.subf %119, %118 : vector<2x32xf32>
      %121 = math.exp %120 : vector<2x32xf32>
      %cst_55 = arith.constant 1.000000e+00 : f32
      %122 = vector.broadcast %cst_55 : f32 to vector<2x32xf32>
      %123 = arith.addf %122, %121 : vector<2x32xf32>
      %cst_56 = arith.constant 1.000000e+00 : f32
      %124 = vector.broadcast %cst_56 : f32 to vector<2x32xf32>
      %125 = arith.divf %124, %123 : vector<2x32xf32>
      %126 = arith.mulf %115, %arg19 : vector<2x32xf32>
      %127 = arith.mulf %107, %117 : vector<2x32xf32>
      %128 = arith.addf %126, %127 : vector<2x32xf32>
      %129 = math.tanh %128 : vector<2x32xf32>
      %130 = arith.mulf %125, %129 : vector<2x32xf32>
      %131 = arith.index_cast %arg17 : i32 to index
      %c0_57 = arith.constant 0 : index
      %c0_58 = arith.constant 0 : index
      %132 = vector.load %arg16[%131, %c0_57, %c0_58] : memref<47x2x32xf32, #tpu.memory_space<vmem>>, vector<1x2x32xf32>
      %133 = vector.shape_cast %132 : vector<1x2x32xf32> to vector<2x32xf32>
      %134 = vector.shape_cast %130 : vector<2x32xf32> to vector<1x2x32xf32>
      tpu.vector_store %arg16[%131, %c0_57, %c0_58], %134 {strides = array<i32>} : memref<47x2x32xf32, #tpu.memory_space<vmem>>, vector<1x2x32xf32>,
      scf.yield %130, %128 : vector<2x32xf32>, vector<2x32xf32>
    }
    %c47_i32_21 = arith.constant 47 : i32
    %c0_22 = arith.constant 0 : index
    %c0_23 = arith.constant 0 : index
    %74 = vector.load %arg7[%c0_22, %c0_23] : memref<32x128xf32, #tpu.memory_space<vmem>>, vector<32x128xf32>
    %c0_24 = arith.constant 0 : index
    %c0_25 = arith.constant 0 : index
    %75 = vector.load %arg8[%c0_24, %c0_25] : memref<32x128xf32, #tpu.memory_space<vmem>>, vector<32x128xf32>
    %c0_26 = arith.constant 0 : index
    %c0_27 = arith.constant 0 : index
    %76 = vector.load %arg9[%c0_26, %c0_27] : memref<1x128xf32, #tpu.memory_space<vmem>>, vector<1x128xf32>
    %c0_i32_28 = arith.constant 0 : i32
    %c47_i32_29 = arith.constant 47 : i32
    %77 = arith.addi %c0_i32_28, %c47_i32_29 : i32
    %c1_i32_30 = arith.constant 1 : i32
    %78:2 = scf.for %arg17 = %c0_i32_28 to %77 step %c1_i32_30 iter_args(%arg18 = %70, %arg19 = %70) -> (vector<2x32xf32>, vector<2x32xf32>)  : i32 {
      %95 = arith.index_cast %arg17 : i32 to index
      %c0_45 = arith.constant 0 : index
      %c0_46 = arith.constant 0 : index
      %96 = vector.load %arg16[%95, %c0_45, %c0_46] : memref<47x2x32xf32, #tpu.memory_space<vmem>>, vector<1x2x32xf32>
      %97 = vector.shape_cast %96 : vector<1x2x32xf32> to vector<2x32xf32>
      %cst_47 = arith.constant dense<0.000000e+00> : vector<2x128xf32>
      %98 = tpu.matmul %97, %74, %cst_47 {dimension_numbers = #tpu.dot_dimension_numbers<[1], [0], [0], [1], [0, 0, 1, 1], [], []>} : vector<2x32xf32>, vector<32x128xf32>, vector<2x128xf32> -> vector<2x128xf32>
      %cst_48 = arith.constant dense<0.000000e+00> : vector<2x128xf32>
      %99 = tpu.matmul %arg18, %75, %cst_48 {dimension_numbers = #tpu.dot_dimension_numbers<[1], [0], [0], [1], [0, 0, 1, 1], [], []>} : vector<2x32xf32>, vector<32x128xf32>, vector<2x128xf32> -> vector<2x128xf32>
      %100 = arith.addf %98, %99 : vector<2x128xf32>
      %101 = vector.broadcast %76 : vector<1x128xf32> to vector<2x128xf32>
      %102 = arith.addf %100, %101 : vector<2x128xf32>
      %103 = vector.extract_strided_slice %102 {offsets = [0, 0], sizes = [2, 32], strides = [1, 1]} : vector<2x128xf32> to vector<2x32xf32>
      %cst_49 = arith.constant 0.000000e+00 : f32
      %104 = vector.broadcast %cst_49 : f32 to vector<2x32xf32>
      %105 = arith.subf %104, %103 : vector<2x32xf32>
      %106 = math.exp %105 : vector<2x32xf32>
      %cst_50 = arith.constant 1.000000e+00 : f32
      %107 = vector.broadcast %cst_50 : f32 to vector<2x32xf32>
      %108 = arith.addf %107, %106 : vector<2x32xf32>
      %cst_51 = arith.constant 1.000000e+00 : f32
      %109 = vector.broadcast %cst_51 : f32 to vector<2x32xf32>
      %110 = arith.divf %109, %108 : vector<2x32xf32>
      %111 = vector.extract_strided_slice %102 {offsets = [0, 32], sizes = [2, 32], strides = [1, 1]} : vector<2x128xf32> to vector<2x32xf32>
      %cst_52 = arith.constant 0.000000e+00 : f32
      %112 = vector.broadcast %cst_52 : f32 to vector<2x32xf32>
      %113 = arith.subf %112, %111 : vector<2x32xf32>
      %114 = math.exp %113 : vector<2x32xf32>
      %cst_53 = arith.constant 1.000000e+00 : f32
      %115 = vector.broadcast %cst_53 : f32 to vector<2x32xf32>
      %116 = arith.addf %115, %114 : vector<2x32xf32>
      %cst_54 = arith.constant 1.000000e+00 : f32
      %117 = vector.broadcast %cst_54 : f32 to vector<2x32xf32>
      %118 = arith.divf %117, %116 : vector<2x32xf32>
      %119 = vector.extract_strided_slice %102 {offsets = [0, 64], sizes = [2, 32], strides = [1, 1]} : vector<2x128xf32> to vector<2x32xf32>
      %120 = math.tanh %119 : vector<2x32xf32>
      %121 = vector.extract_strided_slice %102 {offsets = [0, 96], sizes = [2, 32], strides = [1, 1]} : vector<2x128xf32> to vector<2x32xf32>
      %cst_55 = arith.constant 0.000000e+00 : f32
      %122 = vector.broadcast %cst_55 : f32 to vector<2x32xf32>
      %123 = arith.subf %122, %121 : vector<2x32xf32>
      %124 = math.exp %123 : vector<2x32xf32>
      %cst_56 = arith.constant 1.000000e+00 : f32
      %125 = vector.broadcast %cst_56 : f32 to vector<2x32xf32>
      %126 = arith.addf %125, %124 : vector<2x32xf32>
      %cst_57 = arith.constant 1.000000e+00 : f32
      %127 = vector.broadcast %cst_57 : f32 to vector<2x32xf32>
      %128 = arith.divf %127, %126 : vector<2x32xf32>
      %129 = arith.mulf %118, %arg19 : vector<2x32xf32>
      %130 = arith.mulf %110, %120 : vector<2x32xf32>
      %131 = arith.addf %129, %130 : vector<2x32xf32>
      %132 = math.tanh %131 : vector<2x32xf32>
      %133 = arith.mulf %128, %132 : vector<2x32xf32>
      %134 = arith.index_cast %arg17 : i32 to index
      %c0_58 = arith.constant 0 : index
      %c0_59 = arith.constant 0 : index
      %135 = vector.load %arg16[%134, %c0_58, %c0_59] : memref<47x2x32xf32, #tpu.memory_space<vmem>>, vector<1x2x32xf32>
      %136 = vector.shape_cast %135 : vector<1x2x32xf32> to vector<2x32xf32>
      %137 = vector.shape_cast %133 : vector<2x32xf32> to vector<1x2x32xf32>
      tpu.vector_store %arg16[%134, %c0_58, %c0_59], %137 {strides = array<i32>} : memref<47x2x32xf32, #tpu.memory_space<vmem>>, vector<1x2x32xf32>,
      scf.yield %133, %131 : vector<2x32xf32>, vector<2x32xf32>
    }
    %c47_i32_31 = arith.constant 47 : i32
    %c0_32 = arith.constant 0 : index
    %c0_33 = arith.constant 0 : index
    %79 = vector.load %arg10[%c0_32, %c0_33] : memref<32x32xf32, #tpu.memory_space<vmem>>, vector<32x32xf32>
    %cst_34 = arith.constant dense<0.000000e+00> : vector<2x32xf32>
    %80 = tpu.matmul %78#0, %79, %cst_34 {dimension_numbers = #tpu.dot_dimension_numbers<[1], [0], [0], [1], [0, 0, 1, 1], [], []>} : vector<2x32xf32>, vector<32x32xf32>, vector<2x32xf32> -> vector<2x32xf32>
    %c0_35 = arith.constant 0 : index
    %c0_36 = arith.constant 0 : index
    %81 = vector.load %arg11[%c0_35, %c0_36] : memref<1x32xf32, #tpu.memory_space<vmem>>, vector<1x32xf32>
    %82 = vector.broadcast %81 : vector<1x32xf32> to vector<2x32xf32>
    %83 = arith.addf %80, %82 : vector<2x32xf32>
    %cst_37 = arith.constant 0.000000e+00 : f32
    %84 = vector.broadcast %cst_37 : f32 to vector<2x32xf32>
    %85 = arith.maximumf %83, %84 : vector<2x32xf32>
    %c0_38 = arith.constant 0 : index
    %c0_39 = arith.constant 0 : index
    %86 = vector.load %arg12[%c0_38, %c0_39] : memref<1x32xf32, #tpu.memory_space<vmem>>, vector<1x32xf32>
    %87 = vector.broadcast %86 : vector<1x32xf32> to vector<2x32xf32>
    %88 = arith.mulf %85, %87 : vector<2x32xf32>
    %cst_40 = arith.constant dense<0.000000e+00> : vector<2xf32>
    %89 = vector.multi_reduction <add>, %88, %cst_40 [1] : vector<2x32xf32> to vector<2xf32>
    %90 = vector.shape_cast %89 : vector<2xf32> to vector<2x1xf32>
    %c0_41 = arith.constant 0 : index
    %c0_42 = arith.constant 0 : index
    %91 = vector.load %arg13[%c0_41, %c0_42] : memref<1x1xf32, #tpu.memory_space<vmem>>, vector<1x1xf32>
    %92 = vector.broadcast %91 : vector<1x1xf32> to vector<2x1xf32>
    %93 = arith.addf %90, %92 : vector<2x1xf32>
    %c0_43 = arith.constant 0 : index
    %c0_44 = arith.constant 0 : index
    %94 = vector.load %arg14[%c0_43, %c0_44] : memref<2x1xf32, #tpu.memory_space<vmem>>, vector<2x1xf32>
    tpu.vector_store %arg14[%c0_43, %c0_44], %93 {strides = array<i32>} : memref<2x1xf32, #tpu.memory_space<vmem>>, vector<2x1xf32>,
    return
  }
  func.func @transform_0(%arg0: i32) -> (i32, i32) {
    %c0_i32 = arith.constant 0 : i32
    %c0_i32_0 = arith.constant 0 : i32
    return %c0_i32, %arg0 : i32, i32
  }
  func.func @transform_1(%arg0: i32) -> (i32, i32) {
    %c0_i32 = arith.constant 0 : i32
    %c0_i32_0 = arith.constant 0 : i32
    return %c0_i32, %arg0 : i32, i32
  }
  func.func @transform_2(%arg0: i32) -> (i32, i32) {
    %c0_i32 = arith.constant 0 : i32
    %c0_i32_0 = arith.constant 0 : i32
    %c0_i32_1 = arith.constant 0 : i32
    return %c0_i32, %c0_i32_0 : i32, i32
  }
  func.func @transform_3(%arg0: i32) -> (i32, i32) {
    %c0_i32 = arith.constant 0 : i32
    %c0_i32_0 = arith.constant 0 : i32
    %c0_i32_1 = arith.constant 0 : i32
    return %c0_i32, %c0_i32_0 : i32, i32
  }
  func.func @transform_4(%arg0: i32) -> (i32, i32) {
    %c0_i32 = arith.constant 0 : i32
    %c0_i32_0 = arith.constant 0 : i32
    %c0_i32_1 = arith.constant 0 : i32
    return %c0_i32, %c0_i32_0 : i32, i32
  }
  func.func @transform_5(%arg0: i32) -> (i32, i32) {
    %c0_i32 = arith.constant 0 : i32
    %c0_i32_0 = arith.constant 0 : i32
    %c0_i32_1 = arith.constant 0 : i32
    return %c0_i32, %c0_i32_0 : i32, i32
  }
  func.func @transform_6(%arg0: i32) -> (i32, i32) {
    %c0_i32 = arith.constant 0 : i32
    %c0_i32_0 = arith.constant 0 : i32
    %c0_i32_1 = arith.constant 0 : i32
    return %c0_i32, %c0_i32_0 : i32, i32
  }
  func.func @transform_7(%arg0: i32) -> (i32, i32) {
    %c0_i32 = arith.constant 0 : i32
    %c0_i32_0 = arith.constant 0 : i32
    %c0_i32_1 = arith.constant 0 : i32
    return %c0_i32, %c0_i32_0 : i32, i32
  }
  func.func @transform_8(%arg0: i32) -> (i32, i32) {
    %c0_i32 = arith.constant 0 : i32
    %c0_i32_0 = arith.constant 0 : i32
    %c0_i32_1 = arith.constant 0 : i32
    return %c0_i32, %c0_i32_0 : i32, i32
  }
  func.func @transform_9(%arg0: i32) -> (i32, i32) {
    %c0_i32 = arith.constant 0 : i32
    %c0_i32_0 = arith.constant 0 : i32
    %c0_i32_1 = arith.constant 0 : i32
    return %c0_i32, %c0_i32_0 : i32, i32
  }
  func.func @transform_10(%arg0: i32) -> (i32, i32) {
    %c0_i32 = arith.constant 0 : i32
    %c0_i32_0 = arith.constant 0 : i32
    %c0_i32_1 = arith.constant 0 : i32
    return %c0_i32, %c0_i32_0 : i32, i32
  }
  func.func @transform_11(%arg0: i32) -> (i32, i32) {
    %c0_i32 = arith.constant 0 : i32
    %c0_i32_0 = arith.constant 0 : i32
    %c0_i32_1 = arith.constant 0 : i32
    return %c0_i32, %c0_i32_0 : i32, i32
  }
  func.func @transform_12(%arg0: i32) -> (i32, i32) {
    %c0_i32 = arith.constant 0 : i32
    %c0_i32_0 = arith.constant 0 : i32
    %c0_i32_1 = arith.constant 0 : i32
    return %c0_i32, %c0_i32_0 : i32, i32
  }
  func.func @transform_13(%arg0: i32) -> (i32, i32) {
    %c0_i32 = arith.constant 0 : i32
    %c0_i32_0 = arith.constant 0 : i32
    return %arg0, %c0_i32 : i32, i32
  }
}

</mosaic_0001>

<bundles_post_ra>
// kernel: lstmpe_forward.1
= control target key start
LH: loop header
LB: loop body
LE: loop exit
PB: predicated region body
PF: predicated region fallthrough
CT: control target
= control target key end

     0   :  { %v74_v0 = vlaneseq  ;;  %v3276_v31 = vmov 1966171168   ;;  %s4327_s1 = inlined_call_operand.vmem [shape: f32[47,2], index: 1, kind: input, shape index: {}]   ;;  %s4328_s3 = inlined_call_operand.vmem [shape: f32[47,128], index: 3, kind: input, shape index: {}]   ;;  %s4329_s0 = inlined_call_operand.vmem [shape: s32[47,2], index: 0, kind: input, shape index: {}]   ;;  %s4330_s4 = inlined_call_operand.vmem [shape: f32[1,128], index: 4, kind: input, shape index: {}]   ;;  %s4331_s2 = inlined_call_operand.vmem [shape: f32[5,128], index: 2, kind: input, shape index: {}]   ;;  %s4332_s5 = inlined_call_operand.vmem [shape: f32[32,128], index: 5, kind: input, shape index: {}]   ;;  %s4333_s6 = inlined_call_operand.vmem [shape: f32[32,128], index: 6, kind: input, shape index: {}]   ;;  %s4334_s7 = inlined_call_operand.vmem [shape: f32[32,128], index: 7, kind: input, shape index: {}]   ;;  %s4335_s8 = inlined_call_operand.vmem [shape: f32[1,128], index: 8, kind: input, shape index: {}]   ;;  %s4336_s9 = inlined_call_operand.vmem [shape: f32[32,32], index: 9, kind: input, shape index: {}]   ;;  %s4337_s10 = inlined_call_operand.vmem [shape: f32[1,32], index: 10, kind: input, shape index: {}]   ;;  %s4338_s11 = inlined_call_operand.vmem [shape: f32[1,32], index: 11, kind: input, shape index: {}]   ;;  %s4339_s13 = inlined_call_operand.vmem [shape: f32[2,1], index: 13, kind: output, shape index: {}]   ;;  %s4340_s12 = inlined_call_operand.<no memory space> [shape: f32[1,1], index: 12, kind: input, shape index: {}]  }
   0x1   :  { %v52_v2 = vld [vmem:[%s4327_s1] sm:$0xff]  ;;  %v53_v23 = vld [vmem:[%s4327_s1 + $0x8] sm:$0xff]  ;;  %v72_v32 = vunpack.c.l.s4 %v3276_v31  ;;  %v54_v38 = vld [vmem:[%s4327_s1 + $0x10] sm:$0xff] }
   0x2   :  { %v75_v1 = vshrl.u32 %v74_v0, 7  ;;  %v3386_v17 = vld [vmem:[%s4327_s1 + $0x20] sm:$0xff]  ;;  %v3402_v24 = vld [vmem:[%s4327_s1 + $0x28] sm:$0x7f]  ;;  %v3422_v39 = vld [vmem:[%s4328_s3 + $0x10] sm:$0xff] }
   0x3   :  { %v73_v35 = vunpack.c.0.s8 %v72_v32  ;;  %v3444_v50 = vld [vmem:[%s4329_s0 + $0x20] sm:$0xff]  ;;  %v55_v55 = vld [vmem:[%s4327_s1 + $0x18] sm:$0xff]  ;;  %v3466_v63 = vld [vmem:[%s4329_s0 + $0x28] sm:$0x7f] }
   0x4   :  { %v3361_v3 = vsub.s32 0, %v75_v1  ;;  %v3363_v4 = vsub.s32 2, %v75_v1  ;;  %v3365_v5 = vsub.s32 3, %v75_v1  ;;  %v3367_v6 = vsub.s32 1, %v75_v1  ;;  %v3525_v31 = vld [vmem:[%s4329_s0 + $0x8] sm:$0xff] }
   0x5   :  { %v3373_v11 = vsub.s32 5, %v75_v1  ;;  %v3375_v12 = vsub.s32 4, %v75_v1  ;;  %v3377_v13 = vsub.s32 7, %v75_v1  ;;  %v3381_v16 = vsub.s32 6, %v75_v1 }
   0x6   :  { %v380_v7 = vrot.slane %v52_v2, %v3363_v4  ;;  %v366_v8 = vrot.slane %v52_v2, %v3361_v3  ;;  %v387_v9 = vrot.slane %v52_v2, %v3365_v5  ;;  %v373_v10 = vrot.slane %v52_v2, %v3367_v6 }
   0x7   :  { %v401_v14 = vrot.slane %v52_v2, %v3373_v11  ;;  %v394_v15 = vrot.slane %v52_v2, %v3375_v12  ;;  %v415_v18 = vrot.slane %v52_v2, %v3377_v13  ;;  %v625_v19 = vrot.slane %v3386_v17, %v3373_v11 }
   0x8   :  { %382 = vbcast.lane.b32.xlu1 %v380_v7, 256  ;;  %368 = vbcast.lane.b32.xlu0 %v366_v8, 256  ;;  %v408_v20 = vrot.slane %v52_v2, %v3381_v16  ;;  %v639_v21 = vrot.slane %v3386_v17, %v3377_v13  ;;  %v632_v22 = vrot.slane %v3386_v17, %v3381_v16 }
   0x9   :  { %v681_v25 = vrot.slane %v3402_v24, %v3373_v11  ;;  %v688_v26 = vrot.slane %v3402_v24, %v3381_v16  ;;  %v429_v27 = vrot.slane %v53_v23, %v3367_v6  ;;  %v422_v28 = vrot.slane %v53_v23, %v3361_v3 }
   0xa   :  { %v443_v29 = vrot.slane %v53_v23, %v3365_v5  ;;  %v436_v30 = vrot.slane %v53_v23, %v3363_v4  ;;  %v457_v33 = vrot.slane %v53_v23, %v3373_v11  ;;  %v450_v34 = vrot.slane %v53_v23, %v3375_v12 }
   0xb   :  { %v471_v36 = vrot.slane %v53_v23, %v3377_v13  ;;  %v464_v37 = vrot.slane %v53_v23, %v3381_v16  ;;  %v3424_v40 = vsub.s32 %v73_v35, %v75_v1  ;;  %v485_v41 = vrot.slane %v54_v38, %v3367_v6 }
   0xc   :  { %389 = vbcast.lane.b32.xlu1 %v387_v9, 256  ;;  %375 = vbcast.lane.b32.xlu0 %v373_v10, 256  ;;  %v478_v42 = vrot.slane %v54_v38, %v3361_v3  ;;  %v499_v45 = vrot.slane %v54_v38, %v3365_v5  ;;  %v492_v46 = vrot.slane %v54_v38, %v3363_v4 }
   0xd   :  { %v3430_v43 = vrot.slane %v3422_v39, %v3424_v40  ;;  %v513_v48 = vrot.slane %v54_v38, %v3373_v11  ;;  %v506_v49 = vrot.slane %v54_v38, %v3375_v12  ;;  %v1291_v51 = vrot.slane %v3444_v50, %v3373_v11 }
   0xe   :  { %v1298_v52 = vrot.slane %v3444_v50, %v3381_v16  ;;  %v527_v53 = vrot.slane %v54_v38, %v3377_v13  ;;  %v520_v54 = vrot.slane %v54_v38, %v3381_v16  ;;  %v1305_v56 = vrot.slane %v3444_v50, %v3377_v13 }
   0xf   :  { %v183_v44 = vcombine.high %v3430_v43, %v3430_v43  ;;  %v541_v57 = vrot.slane %v55_v55, %v3367_v6  ;;  %v534_v58 = vrot.slane %v55_v55, %v3361_v3  ;;  %v555_v59 = vrot.slane %v55_v55, %v3365_v5 }
  0x10   :  { %403 = vbcast.lane.b32.xlu1 %v401_v14, 256  ;;  %396 = vbcast.lane.b32.xlu0 %v394_v15, 256  ;;  %v548_v60 = vrot.slane %v55_v55, %v3363_v4  ;;  %v569_v61 = vrot.slane %v55_v55, %v3373_v11  ;;  %v562_v62 = vrot.slane %v55_v55, %v3375_v12 }
  0x11   :  { %v3437_v47 = vrot.slane %v183_v44, %v3424_v40  ;;  %v1347_v0 = vrot.slane %v3466_v63, %v3373_v11  ;;  %v583_v2 = vrot.slane %v55_v55, %v3377_v13  ;;  %v576_v7 = vrot.slane %v55_v55, %v3381_v16 }
  0x12   :  { %v597_v8 = vrot.slane %v3386_v17, %v3367_v6  ;;  %v590_v9 = vrot.slane %v3386_v17, %v3361_v3  ;;  %v611_v10 = vrot.slane %v3386_v17, %v3365_v5  ;;  %v604_v14 = vrot.slane %v3386_v17, %v3363_v4 }
  0x13   :  { %v618_v15 = vrot.slane %v3386_v17, %v3375_v12  ;;  %v660_v23 = vrot.slane %v3402_v24, %v3363_v4  ;;  %v674_v17 = vrot.slane %v3402_v24, %v3375_v12  ;;  %v1095_v38 = vrot.slane %v3525_v31, %v3367_v6 }
  0x14   :  { %417 = vbcast.lane.b32.xlu1 %v415_v18, 256  ;;  %410 = vbcast.lane.b32.xlu0 %v408_v20, 256  ;;  %v653_v18 = vrot.slane %v3402_v24, %v3367_v6  ;;  %v646_v20 = vrot.slane %v3402_v24, %v3361_v3 }
  0x18   :  { %431 = vbcast.lane.b32.xlu1 %v429_v27, 256  ;;  %424 = vbcast.lane.b32.xlu0 %v422_v28, 256 }
  0x1c   :  { %445 = vbcast.lane.b32.xlu1 %v443_v29, 256  ;;  %438 = vbcast.lane.b32.xlu0 %v436_v30, 256 }
  0x20   :  { %459 = vbcast.lane.b32.xlu1 %v457_v33, 256  ;;  %452 = vbcast.lane.b32.xlu0 %v450_v34, 256  ;;  %v1088_v34 = vrot.slane %v3525_v31, %v3361_v3 }
  0x24   :  { %473 = vbcast.lane.b32.xlu1 %v471_v36, 256  ;;  %466 = vbcast.lane.b32.xlu0 %v464_v37, 256 }
  0x28   :  { %487 = vbcast.lane.b32.xlu1 %v485_v41, 256  ;;  %480 = vbcast.lane.b32.xlu0 %v478_v42, 256  ;;  %v1102_v41 = vrot.slane %v3525_v31, %v3363_v4 }
  0x2c   :  { %501 = vbcast.lane.b32.xlu1 %v499_v45, 256  ;;  %494 = vbcast.lane.b32.xlu0 %v492_v46, 256  ;;  %v3541_v46 = vld [vmem:[%s4330_s4] ss:$0 sm:$0xff] }
  0x30   :  { %515 = vbcast.lane.b32.xlu1 %v513_v48, 256  ;;  %508 = vbcast.lane.b32.xlu0 %v506_v49, 256  ;;  %v1109_v48 = vrot.slane %v3525_v31, %v3365_v5  ;;  %v1116_v49 = vrot.slane %v3525_v31, %v3375_v12 }
  0x34   :  { %529 = vbcast.lane.b32.xlu1 %v527_v53, 256  ;;  %522 = vbcast.lane.b32.xlu0 %v520_v54, 256  ;;  %v59_v53 = vld [vmem:[%s4328_s3 + $0x8] sm:$0xff] }
  0x38   :  { %543 = vbcast.lane.b32.xlu1 %v541_v57, 256  ;;  %536 = vbcast.lane.b32.xlu0 %v534_v58, 256 }
  0x3c   :  { %557 = vbcast.lane.b32.xlu1 %v555_v59, 256  ;;  %550 = vbcast.lane.b32.xlu0 %v548_v60, 256 }
  0x40   :  { %571 = vbcast.lane.b32.xlu1 %v569_v61, 256  ;;  %564 = vbcast.lane.b32.xlu0 %v562_v62, 256 }
  0x44   :  { %585 = vbcast.lane.b32.xlu1 %v583_v2, 256  ;;  %578 = vbcast.lane.b32.xlu0 %v576_v7, 256  ;;  %v1123_v2 = vrot.slane %v3525_v31, %v3373_v11  ;;  %v126_v7 = vrot.slane %v59_v53, %v3424_v40 }
  0x48   :  { %599 = vbcast.lane.b32.xlu1 %v597_v8, 256  ;;  %592 = vbcast.lane.b32.xlu0 %v590_v9, 256  ;;  %v1130_v9 = vrot.slane %v3525_v31, %v3381_v16 }
  0x4c   :  { %613 = vbcast.lane.b32.xlu1 %v611_v10, 256  ;;  %606 = vbcast.lane.b32.xlu0 %v604_v14, 256  ;;  %v3564_v14 = vld [vmem:[%s4329_s0 + $0x10] sm:$0xff] }
  0x50   :  { %627 = vbcast.lane.b32.xlu1 %v625_v19, 256  ;;  %620 = vbcast.lane.b32.xlu0 %v618_v15, 256  ;;  %v667_v19 = vrot.slane %v3402_v24, %v3365_v5 }
  0x54   :  { %641 = vbcast.lane.b32.xlu1 %v639_v21, 256  ;;  %634 = vbcast.lane.b32.xlu0 %v632_v22, 256  ;;  %v46_v21 = vld [vmem:[%s4329_s0] sm:$0xff] }
  0x55   :  { %v1032_v22 = vrot.slane %v46_v21, %v3361_v3  ;;  %v1039_v27 = vrot.slane %v46_v21, %v3367_v6  ;;  %v1046_v28 = vrot.slane %v46_v21, %v3363_v4  ;;  %v1053_v29 = vrot.slane %v46_v21, %v3365_v5 }
  0x56   :  { %v1060_v30 = vrot.slane %v46_v21, %v3375_v12  ;;  %v1067_v24 = vrot.slane %v46_v21, %v3373_v11  ;;  %v1081_v33 = vrot.slane %v46_v21, %v3377_v13 }
  0x58   :  { %655 = vbcast.lane.b32.xlu1 %v653_v18, 256  ;;  %648 = vbcast.lane.b32.xlu0 %v646_v20, 256 }
  0x5c   :  { %669 = vbcast.lane.b32.xlu1 %v667_v19, 256  ;;  %662 = vbcast.lane.b32.xlu0 %v660_v23, 256 }
  0x60   :  { %683 = vbcast.lane.b32.xlu1 %v681_v25, 256  ;;  %676 = vbcast.lane.b32.xlu0 %v674_v17, 256  ;;  %v58_v25 = vld [vmem:[%s4328_s3] sm:$0xff] }
  0x61   :  { %v77_v32 = vrot.slane %v58_v25, %v3424_v40  ;;  %v70_v37 = vcombine.high %v58_v25, %v58_v25 }
  0x63   :  { %v93_v35 = vrot.slane %v77_v32, %v3424_v40  ;;  %v85_v36 = vcombine.high %v77_v32, %v77_v32  ;;  %v84_v45 = vrot.slane %v70_v37, %v3424_v40 }
  0x64   :  { %690 = vbcast.lane.b32.xlu0 %v688_v26, 256  ;;  %1034 = vbcast.lane.b32.xlu1 %v1032_v22, 256  ;;  %v1074_v26 = vrot.slane %v46_v21, %v3381_v16  ;;  %v1137_v21 = vrot.slane %v3525_v31, %v3377_v13 }
  0x65   :  { %v115_v42 = vcombine.high %v93_v35, %v93_v35  ;;  %v107_v44 = vrot.slane %v85_v36, %v3424_v40  ;;  %v749_v55 = vrot.slane %v93_v35, %v3361_v3  ;;  %v86_v58 = vcombine.high %v84_v45, %v84_v45 }
  0x66   :  { %v100_v10 = vrot.slane %v84_v45, %v3424_v40 }
  0x67   :  { %v757_v54 = vrot.slane %v115_v42, %v3361_v3  ;;  %v117_v57 = vcombine.high %v107_v44, %v107_v44  ;;  %v753_v8 = vrot.slane %v107_v44, %v3361_v3  ;;  %v114_v19 = vrot.slane %v86_v58, %v3424_v40 }
  0x68   :  { %1041 = vbcast.lane.b32.xlu0 %v1039_v27, 256  ;;  %1048 = vbcast.lane.b32.xlu1 %v1046_v28, 256  ;;  %v1144_v28 = vrot.slane %v3564_v14, %v3361_v3  ;;  %v116_v25 = vcombine.high %v100_v10, %v100_v10  ;;  %v142_v44 = vrot.slane %v126_v7, %v3424_v40 }
  0x69   :  { %v761_v20 = vrot.slane %v117_v57, %v3361_v3  ;;  %v769_v31 = vrot.slane %v114_v19, %v3361_v3 }
  0x6c   :  { %1055 = vbcast.lane.b32.xlu0 %v1053_v29, 256  ;;  %1062 = vbcast.lane.b32.xlu1 %v1060_v30, 256  ;;  %v134_v29 = vcombine.high %v126_v7, %v126_v7  ;;  %v765_v30 = vrot.slane %v100_v10, %v3361_v3 }
  0x6e   :  { %v156_v42 = vrot.slane %v134_v29, %v3424_v40 }
  0x70   :  { %1069 = vbcast.lane.b32.xlu0 %v1067_v24, 256  ;;  %1076 = vbcast.lane.b32.xlu1 %v1074_v26, 256  ;;  %v119_v24 = vcombine.high %v59_v53, %v59_v53  ;;  %v785_v10 = vrot.slane %v156_v42, %v3361_v3 }
  0x72   :  { %v133_v45 = vrot.slane %v119_v24, %v3424_v40 }
  0x74   :  { %1083 = vbcast.lane.b32.xlu0 %v1081_v33, 256  ;;  %1090 = vbcast.lane.b32.xlu1 %v1088_v34, 256  ;;  %v118_v33 = vcombine.high %v114_v19, %v114_v19  ;;  %v135_v7 = vcombine.high %v133_v45, %v133_v45  ;;  %v149_v29 = vrot.slane %v133_v45, %v3424_v40 }
  0x76   :  { %v777_v53 = vrot.slane %v118_v33, %v3361_v3  ;;  %v165_v45 = vcombine.high %v149_v29, %v149_v29 }
  0x78   :  { %1097 = vbcast.lane.b32.xlu0 %v1095_v38, 256  ;;  %1104 = vbcast.lane.b32.xlu1 %v1102_v41, 256  ;;  %v1151_v38 = vrot.slane %v3564_v14, %v3367_v6  ;;  %v1158_v41 = vrot.slane %v3564_v14, %v3363_v4 }
  0x7a   :  { %v383_v59 = vpop.permute.xlu1 %382  ;;  %v369_v60 = vpop.permute.xlu0 %368 }
  0x7b   :  { %v701_v61 = vmul.f32 %v3541_v46, %v383_v59  ;;  %v699_v62 = vmul.f32 %v3541_v46, %v369_v60  ;;  %v1165_v60 = vrot.slane %v3564_v14, %v3365_v5 }
  0x7c   :  { %1111 = vbcast.lane.b32.xlu0 %v1109_v48, 256  ;;  %1118 = vbcast.lane.b32.xlu1 %v1116_v49, 256 }
  0x7d   :  { %v3566_v15 = vadd.f32 %v757_v54, %v701_v61  ;;  %v3568_v18 = vadd.f32 %v749_v55, %v699_v62  ;;  %v773_v54 = vrot.slane %v116_v25, %v3361_v3  ;;  %v1172_v61 = vrot.slane %v3564_v14, %v3375_v12 }
  0x7e   :  { %v390_v23 = vpop.permute.xlu1 %389  ;;  %v376_v17 = vpop.permute.xlu0 %375  ;;  %v781_v62 = vrot.slane %v142_v44, %v3361_v3 }
  0x7f   :  { %v702_v22 = vmul.f32 %v3541_v46, %v390_v23  ;;  %v700_v27 = vmul.f32 %v3541_v46, %v376_v17 }
  0x80   :  { %1125 = vbcast.lane.b32.xlu0 %v1123_v2, 256  ;;  %1132 = vbcast.lane.b32.xlu1 %v1130_v9, 256  ;;  %v164_v2 = vcombine.high %v142_v44, %v142_v44  ;;  %v797_v44 = vrot.slane %v149_v29, %v3361_v3 }
  0x81   :  { %v3579_v26 = vadd.f32 %v761_v20, %v702_v22  ;;  %v3581_v32 = vadd.f32 %v753_v8, %v700_v27  ;;  %v166_v20 = vcombine.high %v156_v42, %v156_v42  ;;  %v1179_v22 = vrot.slane %v3564_v14, %v3373_v11 }
  0x82   :  { %v404_v34 = vpop.permute.xlu1 %403  ;;  %v397_v35 = vpop.permute.xlu0 %396  ;;  %v1186_v27 = vrot.slane %v3564_v14, %v3381_v16  ;;  %v789_v33 = vrot.slane %v164_v2, %v3361_v3 }
  0x83   :  { %v704_v36 = vmul.f32 %v3541_v46, %v404_v34  ;;  %v703_v37 = vmul.f32 %v3541_v46, %v397_v35 }
  0x84   :  { %1139 = vbcast.lane.b32.xlu0 %v1137_v21, 256  ;;  %1146 = vbcast.lane.b32.xlu1 %v1144_v28, 256  ;;  %v163_v28 = vrot.slane %v135_v7, %v3424_v40  ;;  %v191_v7 = vrot.slane %v3430_v43, %v3424_v40 }
  0x85   :  { %v3593_v48 = vadd.f32 %v769_v31, %v704_v36  ;;  %v3595_v49 = vadd.f32 %v765_v30, %v703_v37  ;;  %v3622_v30 = vld [vmem:[%s4329_s0 + $0x18] sm:$0xff]  ;;  %v793_v31 = vrot.slane %v166_v20, %v3361_v3 }
  0x86   :  { %v418_v55 = vpop.permute.xlu1 %417  ;;  %v411_v57 = vpop.permute.xlu0 %410  ;;  %v801_v42 = vrot.slane %v163_v28, %v3361_v3  ;;  %v1214_v2 = vrot.slane %v3622_v30, %v3363_v4  ;;  %v1228_v43 = vrot.slane %v3622_v30, %v3375_v12  ;;  %v813_v29 = vrot.slane %v191_v7, %v3361_v3 }
  0x87   :  { %v706_v58 = vmul.f32 %v3541_v46, %v418_v55  ;;  %v705_v59 = vmul.f32 %v3541_v46, %v411_v57  ;;  %v167_v55 = vcombine.high %v163_v28, %v163_v28  ;;  %v168_v57 = vcombine.high %v3422_v39, %v3422_v39 }
  0x88   :  { %1153 = vbcast.lane.b32.xlu0 %v1151_v38, 256  ;;  %1160 = vbcast.lane.b32.xlu1 %v1158_v41, 256  ;;  %v1193_v38 = vrot.slane %v3564_v14, %v3377_v13  ;;  %v1200_v41 = vrot.slane %v3622_v30, %v3361_v3  ;;  %v817_v28 = vrot.slane %v3437_v47, %v3361_v3 }
  0x89   :  { %v3606_v8 = vadd.f32 %v777_v53, %v706_v58  ;;  %v3608_v9 = vadd.f32 %v773_v54, %v705_v59  ;;  %v809_v20 = vrot.slane %v167_v55, %v3361_v3 }
  0x8a   :  { %v432_v19 = vpop.permute.xlu1 %431  ;;  %v425_v23 = vpop.permute.xlu0 %424 }
  0x8b   :  { %v708_v17 = vmul.f32 %v3541_v46, %v432_v19  ;;  %v707_v21 = vmul.f32 %v3541_v46, %v425_v23  ;;  %v182_v19 = vrot.slane %v168_v57, %v3424_v40 }
  0x8c   :  { %1167 = vbcast.lane.b32.xlu0 %v1165_v60, 256  ;;  %1174 = vbcast.lane.b32.xlu1 %v1172_v61, 256  ;;  %v1207_v61 = vrot.slane %v3622_v30, %v3367_v6 }
  0x8d   :  { %v3624_v25 = vadd.f32 %v785_v10, %v708_v17  ;;  %v3626_v24 = vadd.f32 %v781_v62, %v707_v21  ;;  %v805_v62 = vrot.slane %v165_v45, %v3361_v3  ;;  %v1235_v45 = vrot.slane %v3622_v30, %v3373_v11 }
  0x8e   :  { %v446_v34 = vpop.permute.xlu1 %445  ;;  %v439_v35 = vpop.permute.xlu0 %438 }
  0x8f   :  { %v710_v36 = vmul.f32 %v3541_v46, %v446_v34  ;;  %v709_v37 = vmul.f32 %v3541_v46, %v439_v35 }
  0x90   :  { %1181 = vbcast.lane.b32.xlu0 %v1179_v22, 256  ;;  %1188 = vbcast.lane.b32.xlu1 %v1186_v27, 256  ;;  %v1221_v27 = vrot.slane %v3622_v30, %v3365_v5 }
  0x91   :  { %v3638_v53 = vadd.f32 %v793_v31, %v710_v36  ;;  %v3640_v54 = vadd.f32 %v789_v33, %v709_v37  ;;  %v213_v31 = vcombine.high %v191_v7, %v191_v7  ;;  %v61_v33 = vld [vmem:[%s4328_s3 + $0x18] sm:$0xff]  ;;  %v215_v36 = vcombine.high %v3437_v47, %v3437_v47 }
  0x92   :  { %v460_v58 = vpop.permute.xlu1 %459  ;;  %v453_v14 = vpop.permute.xlu0 %452  ;;  %v184_v37 = vcombine.high %v182_v19, %v182_v19  ;;  %v224_v55 = vrot.slane %v61_v33, %v3424_v40  ;;  %v198_v47 = vrot.slane %v182_v19, %v3424_v40  ;;  %v1249_v7 = vrot.slane %v3622_v30, %v3377_v13 }
  0x93   :  { %v712_v59 = vmul.f32 %v3541_v46, %v460_v58  ;;  %v711_v60 = vmul.f32 %v3541_v46, %v453_v14  ;;  %v821_v57 = vrot.slane %v213_v31, %v3361_v3  ;;  %v1242_v58 = vrot.slane %v3622_v30, %v3381_v16 }
  0x94   :  { %1195 = vbcast.lane.b32.xlu0 %v1193_v38, 256  ;;  %1202 = vbcast.lane.b32.xlu1 %v1200_v41, 256  ;;  %v1256_v19 = vrot.slane %v3444_v50, %v3361_v3 }
  0x95   :  { %v3653_v39 = vadd.f32 %v801_v42, %v712_v59  ;;  %v3655_v10 = vadd.f32 %v797_v44, %v711_v60  ;;  %v825_v60 = vrot.slane %v215_v36, %v3361_v3 }
  0x96   :  { %v474_v23 = vpop.permute.xlu1 %473  ;;  %v467_v17 = vpop.permute.xlu0 %466 }
  0x97   :  { %v714_v21 = vmul.f32 %v3541_v46, %v474_v23  ;;  %v713_v22 = vmul.f32 %v3541_v46, %v467_v17  ;;  %v232_v17 = vcombine.high %v224_v55, %v224_v55 }
  0x98   :  { %1209 = vbcast.lane.b32.xlu0 %v1207_v61, 256  ;;  %1216 = vbcast.lane.b32.xlu1 %v1214_v2, 256  ;;  %v212_v61 = vrot.slane %v184_v37, %v3424_v40 }
  0x99   :  { %v3671_v34 = vadd.f32 %v809_v20, %v714_v21  ;;  %v3673_v35 = vadd.f32 %v805_v62, %v713_v22  ;;  %v829_v21 = vrot.slane %v198_v47, %v3361_v3  ;;  %v214_v22 = vcombine.high %v198_v47, %v198_v47 }
  0x9a   :  { %v488_v38 = vpop.permute.xlu1 %487  ;;  %v481_v41 = vpop.permute.xlu0 %480  ;;  %v833_v30 = vrot.slane %v212_v61, %v3361_v3 }
  0x9b   :  { %v716_v42 = vmul.f32 %v3541_v46, %v488_v38  ;;  %v715_v44 = vmul.f32 %v3541_v46, %v481_v41  ;;  %v1263_v41 = vrot.slane %v3444_v50, %v3367_v6 }
  0x9c   :  { %1223 = vbcast.lane.b32.xlu0 %v1221_v27, 256  ;;  %1230 = vbcast.lane.b32.xlu1 %v1228_v43, 256  ;;  %v217_v27 = vcombine.high %v61_v33, %v61_v33  ;;  %v837_v33 = vrot.slane %v214_v22, %v3361_v3 }
  0x9d   :  { %v3686_v14 = vadd.f32 %v817_v28, %v716_v42  ;;  %v3688_v59 = vadd.f32 %v813_v29, %v715_v44  ;;  %v216_v29 = vcombine.high %v212_v61, %v212_v61  ;;  %v1270_v42 = vrot.slane %v3444_v50, %v3363_v4 }
  0x9e   :  { %v502_v62 = vpop.permute.xlu1 %501  ;;  %v495_v2 = vpop.permute.xlu0 %494  ;;  %v254_v44 = vrot.slane %v232_v17, %v3424_v40 }
  0x9f   :  { %v718_v20 = vmul.f32 %v3541_v46, %v502_v62  ;;  %v717_v23 = vmul.f32 %v3541_v46, %v495_v2  ;;  %v841_v47 = vrot.slane %v216_v29, %v3361_v3  ;;  %v62_v29 = vld [vmem:[%s4328_s3 + $0x20] sm:$0xff] }
  0xa0   :  { %1237 = vbcast.lane.b32.xlu0 %v1235_v45, 256  ;;  %1244 = vbcast.lane.b32.xlu1 %v1242_v58, 256  ;;  %v240_v45 = vrot.slane %v224_v55, %v3424_v40  ;;  %v1284_v55 = vrot.slane %v3444_v50, %v3375_v12 }
  0xa1   :  { %v3699_v43 = vadd.f32 %v825_v60, %v718_v20  ;;  %v3701_v28 = vadd.f32 %v821_v57, %v717_v23  ;;  %v231_v60 = vrot.slane %v217_v27, %v3424_v40  ;;  %v1277_v20 = vrot.slane %v3444_v50, %v3365_v5 }
  0xa2   :  { %v516_v31 = vpop.permute.xlu1 %515  ;;  %v509_v36 = vpop.permute.xlu0 %508  ;;  %v849_v23 = vrot.slane %v254_v44, %v3361_v3  ;;  %v262_v17 = vcombine.high %v240_v45, %v240_v45  ;;  %v264_v27 = vcombine.high %v254_v44, %v254_v44 }
  0xa3   :  { %v720_v37 = vmul.f32 %v3541_v46, %v516_v31  ;;  %v719_v38 = vmul.f32 %v3541_v46, %v509_v36 }
  0xa4   :  { %1251 = vbcast.lane.b32.xlu0 %v1249_v7, 256  ;;  %1258 = vbcast.lane.b32.xlu1 %v1256_v19, 256  ;;  %v845_v19 = vrot.slane %v240_v45, %v3361_v3 }
  0xa5   :  { %v3713_v57 = vadd.f32 %v833_v30, %v720_v37  ;;  %v3715_v58 = vadd.f32 %v829_v21, %v719_v38  ;;  %v233_v30 = vcombine.high %v231_v60, %v231_v60 }
  0xa6   :  { %v530_v61 = vpop.permute.xlu1 %529  ;;  %v523_v62 = vpop.permute.xlu0 %522 }
  0xa7   :  { %v722_v2 = vmul.f32 %v3541_v46, %v530_v61  ;;  %v721_v7 = vmul.f32 %v3541_v46, %v523_v62  ;;  %v261_v61 = vrot.slane %v233_v30, %v3424_v40 }
  0xa8   :  { %1265 = vbcast.lane.b32.xlu0 %v1263_v41, 256  ;;  %1272 = vbcast.lane.b32.xlu1 %v1270_v42, 256  ;;  %v853_v41 = vrot.slane %v262_v17, %v3361_v3  ;;  %v247_v42 = vrot.slane %v231_v60, %v3424_v40  ;;  %v266_v60 = vcombine.high %v62_v29, %v62_v29 }
  0xa9   :  { %v3727_v21 = vadd.f32 %v841_v47, %v722_v2  ;;  %v3729_v22 = vadd.f32 %v837_v33, %v721_v7  ;;  %v273_v33 = vrot.slane %v62_v29, %v3424_v40  ;;  %v857_v47 = vrot.slane %v264_v27, %v3361_v3 }
  0xaa   :  { %v544_v31 = vpop.permute.xlu1 %543  ;;  %v537_v36 = vpop.permute.xlu0 %536 }
  0xab   :  { %v724_v37 = vmul.f32 %v3541_v46, %v544_v31  ;;  %v723_v38 = vmul.f32 %v3541_v46, %v537_v36  ;;  %v281_v17 = vcombine.high %v273_v33, %v273_v33  ;;  %v865_v31 = vrot.slane %v261_v61, %v3361_v3 }
  0xac   :  { %1279 = vbcast.lane.b32.xlu0 %v1277_v20, 256  ;;  %1286 = vbcast.lane.b32.xlu1 %v1284_v55, 256  ;;  %v1312_v55 = vrot.slane %v3466_v63, %v3361_v3  ;;  %v265_v36 = vcombine.high %v261_v61, %v261_v61 }
  0xad   :  { %v3739_v44 = vadd.f32 %v849_v23, %v724_v37  ;;  %v3741_v45 = vadd.f32 %v845_v19, %v723_v38  ;;  %v861_v23 = vrot.slane %v247_v42, %v3361_v3  ;;  %v263_v19 = vcombine.high %v247_v42, %v247_v42 }
  0xae   :  { %v558_v62 = vpop.permute.xlu1 %557  ;;  %v551_v2 = vpop.permute.xlu0 %550  ;;  %v1326_v42 = vrot.slane %v3466_v63, %v3363_v4 }
  0xaf   :  { %v726_v7 = vmul.f32 %v3541_v46, %v558_v62  ;;  %v725_v20 = vmul.f32 %v3541_v46, %v551_v2  ;;  %v280_v62 = vrot.slane %v266_v60, %v3424_v40 }
  0xb0   :  { %1293 = vbcast.lane.b32.xlu0 %v1291_v51, 256  ;;  %1300 = vbcast.lane.b32.xlu1 %v1298_v52, 256  ;;  %v1319_v52 = vrot.slane %v3466_v63, %v3367_v6 }
  0xb1   :  { %v3756_v27 = vadd.f32 %v857_v47, %v726_v7  ;;  %v3758_v30 = vadd.f32 %v853_v41, %v725_v20  ;;  %v869_v41 = vrot.slane %v263_v19, %v3361_v3  ;;  %v303_v47 = vrot.slane %v281_v17, %v3424_v40 }
  0xb2   :  { %v572_v29 = vpop.permute.xlu1 %571  ;;  %v565_v37 = vpop.permute.xlu0 %564  ;;  %v873_v7 = vrot.slane %v265_v36, %v3361_v3  ;;  %v289_v20 = vrot.slane %v273_v33, %v3424_v40 }
  0xb3   :  { %v728_v38 = vmul.f32 %v3541_v46, %v572_v29  ;;  %v727_v51 = vmul.f32 %v3541_v46, %v565_v37  ;;  %v881_v19 = vrot.slane %v303_v47, %v3361_v3  ;;  %v313_v17 = vcombine.high %v303_v47, %v303_v47 }
  0xb4   :  { %1307 = vbcast.lane.b32.xlu0 %v1305_v56, 256  ;;  %1314 = vbcast.lane.b32.xlu1 %v1312_v55, 256  ;;  %v1333_v56 = vrot.slane %v3466_v63, %v3365_v5  ;;  %v282_v55 = vcombine.high %v280_v62, %v280_v62  ;;  %v877_v36 = vrot.slane %v289_v20, %v3361_v3 }
  0xb5   :  { %v3773_v61 = vadd.f32 %v865_v31, %v728_v38  ;;  %v3775_v2 = vadd.f32 %v861_v23, %v727_v51  ;;  %v1340_v23 = vrot.slane %v3466_v63, %v3375_v12  ;;  %v311_v37 = vcombine.high %v289_v20, %v289_v20  ;;  %v63_v38 = vld [vmem:[%s4328_s3 + $0x28] sm:$0x7f] }
  0xb6   :  { %v586_v60 = vpop.permute.xlu1 %585  ;;  %v579_v29 = vpop.permute.xlu0 %578  ;;  %v322_v47 = vrot.slane %v63_v38, %v3424_v40 }
  0xb7   :  { %v730_v13 = vmul.f32 %v3541_v46, %v586_v60  ;;  %v729_v50 = vmul.f32 %v3541_v46, %v579_v29  ;;  %v310_v29 = vrot.slane %v282_v55, %v3424_v40 }
  0xb8   :  { %1321 = vbcast.lane.b32.xlu0 %v1319_v52, 256  ;;  %1328 = vbcast.lane.b32.xlu1 %v1326_v42, 256 }
  0xb9   :  { %v3786_v31 = vadd.f32 %v873_v7, %v730_v13  ;;  %v3788_v33 = vadd.f32 %v869_v41, %v729_v50  ;;  %v889_v41 = vrot.slane %v313_v17, %v3361_v3  ;;  %v885_v13 = vrot.slane %v311_v37, %v3361_v3 }
  0xba   :  { %v600_v51 = vpop.permute.xlu1 %599  ;;  %v593_v52 = vpop.permute.xlu0 %592  ;;  %v296_v50 = vrot.slane %v280_v62, %v3424_v40  ;;  %v330_v17 = vcombine.high %v322_v47, %v322_v47 }
  0xbb   :  { %v732_v42 = vmul.f32 %v3541_v46, %v600_v51  ;;  %v731_v60 = vmul.f32 %v3541_v46, %v593_v52 }
  0xbc   :  { %1335 = vbcast.lane.b32.xlu0 %v1333_v56, 256  ;;  %1342 = vbcast.lane.b32.xlu1 %v1340_v23, 256  ;;  %v897_v56 = vrot.slane %v310_v29, %v3361_v3  ;;  %v314_v23 = vcombine.high %v310_v29, %v310_v29 }
  0xbd   :  { %v3799_v7 = vadd.f32 %v881_v19, %v732_v42  ;;  %v3801_v20 = vadd.f32 %v877_v36, %v731_v60  ;;  %v4342_v19 = vrot.slane %v3466_v63, %v3381_v16  ;;  %v315_v36 = vcombine.high %v63_v38, %v63_v38 }
  0xbe   :  { %v614_v1 = vpop.permute.xlu1 %613  ;;  %v607_v51 = vpop.permute.xlu0 %606  ;;  %v312_v42 = vcombine.high %v296_v50, %v296_v50  ;;  %v352_v16 = vrot.slane %v330_v17, %v3424_v40 }
  0xbf   :  { %4341 = vst [vmem:[#allocation5_spill] sm:$0xff] %v3799_v7  ;;  %v734_v52 = vmul.f32 %v3541_v46, %v614_v1  ;;  %v733_v55 = vmul.f32 %v3541_v46, %v607_v51  ;;  %v893_v1 = vrot.slane %v296_v50, %v3361_v3  ;;  %v329_v63 = vrot.slane %v315_v36, %v3424_v40 }
  0xc0   :  { %1349 = vbcast.lane.b32.xlu0 %v1347_v0, 256  ;;  %1356 = vbcast.lane.b32.xlu1 %v4342_v19, 256  ;;  %v905_v0 = vrot.slane %v314_v23, %v3361_v3  ;;  %v913_v23 = vrot.slane %v352_v16, %v3361_v3 }
  0xc1   :  { %v3814_v62 = vadd.f32 %v889_v41, %v734_v52  ;;  %v3816_v37 = vadd.f32 %v885_v13, %v733_v55  ;;  %v901_v41 = vrot.slane %v312_v42, %v3361_v3  ;;  %v338_v13 = vrot.slane %v322_v47, %v3424_v40 }
  0xc2   :  { %v628_v60 = vpop.permute.xlu1 %627  ;;  %v621_v51 = vpop.permute.xlu0 %620  ;;  %v331_v17 = vcombine.high %v329_v63, %v329_v63 }
  0xc3   :  { %v736_v7 = vmul.f32 %v3541_v46, %v628_v60  ;;  %v735_v11 = vmul.f32 %v3541_v46, %v621_v51  ;;  %v362_v60 = vcombine.high %v352_v16, %v352_v16  ;;  %v360_v36 = vcombine.high %v338_v13, %v338_v13 }
  0xc5   :  { %v3824_v38 = vadd.f32 %v897_v56, %v736_v7  ;;  %v3826_v29 = vadd.f32 %v893_v1, %v735_v11  ;;  %v909_v56 = vrot.slane %v338_v13, %v3361_v3 }
  0xc6   :  { %v642_v50 = vpop.permute.xlu1 %641  ;;  %v635_v52 = vpop.permute.xlu0 %634 }
  0xc7   :  { %4343 = vst [vmem:[#allocation6_spill] sm:$0xff] %v3824_v38  ;;  %v738_v55 = vmul.f32 %v3541_v46, %v642_v50  ;;  %v737_v19 = vmul.f32 %v3541_v46, %v635_v52  ;;  %v921_v50 = vrot.slane %v362_v60, %v3361_v3  ;;  %v359_v52 = vrot.slane %v331_v17, %v3424_v40 }
  0xc9   :  { %v3833_v51 = vadd.f32 %v905_v0, %v738_v55  ;;  %v3835_v7 = vadd.f32 %v901_v41, %v737_v19  ;;  %v917_v0 = vrot.slane %v360_v36, %v3361_v3  ;;  %v345_v41 = vrot.slane %v329_v63, %v3424_v40 }
  0xca   :  { %v656_v1 = vpop.permute.xlu1 %655  ;;  %v649_v42 = vpop.permute.xlu0 %648 }
  0xcb   :  { %4344 = vst [vmem:[#allocation7_spill] sm:$0xff] %v3833_v51  ;;  %v740_v47 = vmul.f32 %v3541_v46, %v656_v1  ;;  %v739_v11 = vmul.f32 %v3541_v46, %v649_v42  ;;  %v929_v42 = vrot.slane %v359_v52, %v3361_v3  ;;  %v361_v17 = vcombine.high %v345_v41, %v345_v41 }
  0xcd   :  { %v3842_v38 = vadd.f32 %v913_v23, %v740_v47  ;;  %v3844_v16 = vadd.f32 %v909_v56, %v739_v11  ;;  %v925_v23 = vrot.slane %v345_v41, %v3361_v3  ;;  %v1028_v56 = vld [vmem:[%s4331_s2] sm:$0x1f] }
  0xce   :  { %v670_v55 = vpop.permute.xlu1 %669  ;;  %v663_v13 = vpop.permute.xlu0 %662  ;;  %v3862_v11 = vrot.slane %v1028_v56, %v3361_v3 }
  0xcf   :  { %v742_v19 = vmul.f32 %v3541_v46, %v670_v55  ;;  %v741_v1 = vmul.f32 %v3541_v46, %v663_v13  ;;  %v3870_v55 = vrot.slane %v1028_v56, %v3367_v6 }
  0xd1   :  { %v3851_v51 = vadd.f32 %v921_v50, %v742_v19  ;;  %v3853_v60 = vadd.f32 %v917_v0, %v741_v1  ;;  %v933_v0 = vrot.slane %v361_v17, %v3361_v3  ;;  %v3874_v1 = vrot.slane %v1028_v56, %v3363_v4 }
  0xd2   :  { %v684_v40 = vpop.permute.xlu1 %683  ;;  %v677_v63 = vpop.permute.xlu0 %676 }
  0xd3   :  { %v744_v36 = vmul.f32 %v3541_v46, %v684_v40  ;;  %v743_v47 = vmul.f32 %v3541_v46, %v677_v63  ;;  %v3877_v40 = vrot.slane %v1028_v56, %v3365_v5 }
  0xd5   :  { %v3864_v50 = vadd.f32 %v929_v42, %v744_v36  ;;  %v3866_v52 = vadd.f32 %v925_v23, %v743_v47  ;;  %v3880_v42 = vrot.slane %v1028_v56, %v3375_v12 }
  0xd6   :  { %v691_v41 = vpop.permute.xlu0 %690  ;;  %v1035_v13 = vpop.permute.xlu1 %1034 }
  0xd7   :  { %v745_v19 = vmul.f32 %v3541_v46, %v691_v41  ;;  %vm1358_vm0 = vcmp.eq.s32.totalorder %v1035_v13, 0  ;;  %vm1597_vm1 = vcmp.eq.s32.totalorder %v1035_v13, 1  ;;  %vm1836_vm2 = vcmp.eq.s32.totalorder %v1035_v13, 2 }
  0xd8   :  { %v1503_v3 = vsel %vm1358_vm0, %v3862_v11, 0.0  ;;  %vm2075_vm3 = vcmp.eq.s32.totalorder %v1035_v13, 3  ;;  %v1742_v46 = vsel %vm1597_vm1, %v3870_v55, 0.0  ;;  %vm2314_vm4 = vcmp.eq.s32.totalorder %v1035_v13, 4 }
  0xd9   :  { %v3883_v23 = vadd.f32 %v933_v0, %v745_v19  ;;  %v1550_v6 = vadd.f32 %v1503_v3, %v3568_v18  ;;  %v1981_v12 = vsel %vm1836_vm2, %v3874_v1, 0.0  ;;  %v2220_v56 = vsel %vm2075_vm3, %v3877_v40, 0.0 }
  0xda   :  { %v1042_v17 = vpop.permute.xlu0 %1041  ;;  %v1049_v5 = vpop.permute.xlu1 %1048  ;;  %v2459_v18 = vsel %vm2314_vm4, %v3880_v42, 0.0 }
  0xdb   :  { %4345 = vst [vmem:[#allocation8_spill] sm:$0xff] %v3883_v23  ;;  %v1789_v4 = vadd.f32 %v1742_v46, %v1550_v6  ;;  %vm1359_vm5 = vcmp.eq.s32.totalorder %v1042_v17, 0  ;;  %vm1598_vm6 = vcmp.eq.s32.totalorder %v1042_v17, 1  ;;  %vm1837_vm7 = vcmp.eq.s32.totalorder %v1042_v17, 2 }
  0xdc   :  { %v1504_v63 = vsel %vm1359_vm5, %v3862_v11, 0.0  ;;  %vm2076_vm8 = vcmp.eq.s32.totalorder %v1042_v17, 3  ;;  %vm2315_vm9 = vcmp.eq.s32.totalorder %v1042_v17, 4  ;;  %v1743_v0 = vsel %vm1598_vm6, %v3870_v55, 0.0 }
  0xdd   :  { %v2028_v36 = vadd.f32 %v1981_v12, %v1789_v4  ;;  %v1551_v47 = vadd.f32 %v1504_v63, %v3581_v32  ;;  %v1982_v41 = vsel %vm1837_vm7, %v3874_v1, 0.0  ;;  %vm1360_vm10 = vcmp.eq.s32.totalorder %v1049_v5, 0 }
  0xde   :  { %vm1599_vm11 = vcmp.eq.s32.totalorder %v1049_v5, 1  ;;  %v2221_v3 = vsel %vm2076_vm8, %v3877_v40, 0.0  ;;  %v1505_v6 = vsel %vm1360_vm10, %v3862_v11, 0.0  ;;  %v1056_v46 = vpop.permute.xlu0 %1055  ;;  %v2460_v4 = vsel %vm2315_vm9, %v3880_v42, 0.0 }
  0xdf   :  { %v2267_v13 = vadd.f32 %v2220_v56, %v2028_v36  ;;  %v1790_v19 = vadd.f32 %v1743_v0, %v1551_v47  ;;  %v1552_v12 = vadd.f32 %v1505_v6, %v3566_v15  ;;  %vm1838_vm12 = vcmp.eq.s32.totalorder %v1049_v5, 2  ;;  %v1063_v56 = vpop.permute.xlu1 %1062 }
  0xe0   :  { %vm2077_vm13 = vcmp.eq.s32.totalorder %v1049_v5, 3  ;;  %v1744_v63 = vsel %vm1599_vm11, %v3870_v55, 0.0  ;;  %vm2316_vm14 = vcmp.eq.s32.totalorder %v1049_v5, 4  ;;  %vm1361_vm15 = vcmp.eq.s32.totalorder %v1056_v46, 0 }
  0xe1   :  { %v2506_v32 = vadd.f32 %v2459_v18, %v2267_v13  ;;  %v2029_v17 = vadd.f32 %v1982_v41, %v1790_v19  ;;  %v1791_v23 = vadd.f32 %v1744_v63, %v1552_v12  ;;  %vm1600_vm0 = vcmp.eq.s32.totalorder %v1056_v46, 1 }
  0xe2   :  { %vm1839_vm1 = vcmp.eq.s32.totalorder %v1056_v46, 2  ;;  %v1983_v47 = vsel %vm1838_vm12, %v3874_v1, 0.0  ;;  %v2222_v0 = vsel %vm2077_vm13, %v3877_v40, 0.0  ;;  %v1506_v15 = vsel %vm1361_vm15, %v3862_v11, 0.0 }
  0xe3   :  { %2553 = vst [vmem:[#allocation2] sm:$0x3] %v2506_v32  ;;  %v2268_v36 = vadd.f32 %v2221_v3, %v2029_v17  ;;  %v2030_v6 = vadd.f32 %v1983_v47, %v1791_v23  ;;  %v2461_v18 = vsel %vm2316_vm14, %v3880_v42, 0.0  ;;  %v1553_v41 = vadd.f32 %v1506_v15, %v3579_v26  ;;  %v1070_v17 = vpop.permute.xlu0 %1069 }
  0xe4   :  { %vm2078_vm2 = vcmp.eq.s32.totalorder %v1056_v46, 3  ;;  %v1745_v13 = vsel %vm1600_vm0, %v3870_v55, 0.0  ;;  %v1984_v19 = vsel %vm1839_vm1, %v3874_v1, 0.0  ;;  %vm1362_vm3 = vcmp.eq.s32.totalorder %v1063_v56, 0 }
  0xe5   :  { %v2507_v5 = vadd.f32 %v2460_v4, %v2268_v36  ;;  %v2269_v12 = vadd.f32 %v2222_v0, %v2030_v6  ;;  %v1792_v3 = vadd.f32 %v1745_v13, %v1553_v41  ;;  %v1507_v32 = vsel %vm1362_vm3, %v3862_v11, 0.0  ;;  %v1077_v41 = vpop.permute.xlu1 %1076 }
  0xe6   :  { %vm1601_vm4 = vcmp.eq.s32.totalorder %v1063_v56, 1  ;;  %v2223_v23 = vsel %vm2078_vm2, %v3877_v40, 0.0  ;;  %vm2317_vm5 = vcmp.eq.s32.totalorder %v1056_v46, 4  ;;  %v1554_v63 = vadd.f32 %v1507_v32, %v3595_v49 }
  0xe7   :  { %2554 = vst [vmem:[#allocation2 + $0x2] sm:$0x3] %v2507_v5  ;;  %vm1840_vm6 = vcmp.eq.s32.totalorder %v1063_v56, 2  ;;  %v2508_v26 = vadd.f32 %v2461_v18, %v2269_v12  ;;  %v2031_v4 = vadd.f32 %v1984_v19, %v1792_v3  ;;  %v1746_v36 = vsel %vm1601_vm4, %v3870_v55, 0.0  ;;  %v1084_v32 = vpop.permute.xlu0 %1083 }
  0xe8   :  { %vm2079_vm7 = vcmp.eq.s32.totalorder %v1063_v56, 3  ;;  %v1793_v47 = vadd.f32 %v1746_v36, %v1554_v63  ;;  %vm2318_vm8 = vcmp.eq.s32.totalorder %v1063_v56, 4  ;;  %vm1363_vm9 = vcmp.eq.s32.totalorder %v1070_v17, 0 }
  0xe9   :  { %vm1602_vm10 = vcmp.eq.s32.totalorder %v1070_v17, 1  ;;  %2555 = vst [vmem:[#allocation2 + $0x4] sm:$0x3] %v2508_v26  ;;  %v2270_v0 = vadd.f32 %v2223_v23, %v2031_v4  ;;  %v2462_v15 = vsel %vm2317_vm5, %v3880_v42, 0.0  ;;  %v1985_v6 = vsel %vm1840_vm6, %v3874_v1, 0.0 }
  0xea   :  { %v1508_v46 = vsel %vm1363_vm9, %v3862_v11, 0.0  ;;  %v2032_v49 = vadd.f32 %v1985_v6, %v1793_v47  ;;  %v2224_v18 = vsel %vm2079_vm7, %v3877_v40, 0.0  ;;  %vm1841_vm11 = vcmp.eq.s32.totalorder %v1070_v17, 2 }
  0xeb   :  { %v1555_v5 = vadd.f32 %v1508_v46, %v3593_v48  ;;  %v2509_v13 = vadd.f32 %v2462_v15, %v2270_v0  ;;  %v2463_v56 = vsel %vm2318_vm8, %v3880_v42, 0.0  ;;  %v1747_v19 = vsel %vm1602_vm10, %v3870_v55, 0.0 }
  0xec   :  { %vm2080_vm12 = vcmp.eq.s32.totalorder %v1070_v17, 3  ;;  %v2271_v12 = vadd.f32 %v2224_v18, %v2032_v49  ;;  %vm2319_vm13 = vcmp.eq.s32.totalorder %v1070_v17, 4  ;;  %vm1364_vm14 = vcmp.eq.s32.totalorder %v1077_v41, 0  ;;  %v1091_v49 = vpop.permute.xlu1 %1090 }
  0xed   :  { %v1794_v3 = vadd.f32 %v1747_v19, %v1555_v5  ;;  %2556 = vst [vmem:[#allocation2 + $0x6] sm:$0x3] %v2509_v13  ;;  %v1986_v23 = vsel %vm1841_vm11, %v3874_v1, 0.0  ;;  %v1509_v63 = vsel %vm1364_vm14, %v3862_v11, 0.0  ;;  %vm1603_vm15 = vcmp.eq.s32.totalorder %v1077_v41, 1 }
  0xee   :  { %vm1842_vm0 = vcmp.eq.s32.totalorder %v1077_v41, 2  ;;  %v2510_v48 = vadd.f32 %v2463_v56, %v2271_v12  ;;  %v1556_v4 = vadd.f32 %v1509_v63, %v3608_v9  ;;  %vm2081_vm1 = vcmp.eq.s32.totalorder %v1077_v41, 3 }
  0xef   :  { %v2033_v26 = vadd.f32 %v1986_v23, %v1794_v3  ;;  %v2225_v36 = vsel %vm2080_vm12, %v3877_v40, 0.0  ;;  %v2464_v47 = vsel %vm2319_vm13, %v3880_v42, 0.0  ;;  %v1748_v17 = vsel %vm1603_vm15, %v3870_v55, 0.0 }
  0xf0   :  { %vm1365_vm2 = vcmp.eq.s32.totalorder %v1084_v32, 0  ;;  %2557 = vst [vmem:[#allocation2 + $0x8] sm:$0x3] %v2510_v48  ;;  %v1795_v15 = vadd.f32 %v1748_v17, %v1556_v4  ;;  %v1987_v6 = vsel %vm1842_vm0, %v3874_v1, 0.0  ;;  %v2226_v18 = vsel %vm2081_vm1, %v3877_v40, 0.0 }
  0xf1   :  { %v2272_v0 = vadd.f32 %v2225_v36, %v2033_v26  ;;  %v1510_v46 = vsel %vm1365_vm2, %v3862_v11, 0.0  ;;  %vm1604_vm3 = vcmp.eq.s32.totalorder %v1084_v32, 1  ;;  %vm1843_vm4 = vcmp.eq.s32.totalorder %v1084_v32, 2 }
  0xf2   :  { %v1557_v9 = vadd.f32 %v1510_v46, %v3606_v8  ;;  %v2034_v13 = vadd.f32 %v1987_v6, %v1795_v15  ;;  %vm2320_vm5 = vcmp.eq.s32.totalorder %v1077_v41, 4  ;;  %v1749_v56 = vsel %vm1604_vm3, %v3870_v55, 0.0  ;;  %v1098_v41 = vpop.permute.xlu0 %1097 }
  0xf3   :  { %v2511_v5 = vadd.f32 %v2464_v47, %v2272_v0  ;;  %vm2082_vm6 = vcmp.eq.s32.totalorder %v1084_v32, 3  ;;  %vm2321_vm7 = vcmp.eq.s32.totalorder %v1084_v32, 4  ;;  %vm1366_vm8 = vcmp.eq.s32.totalorder %v1091_v49, 0 }
  0xf4   :  { %v1796_v19 = vadd.f32 %v1749_v56, %v1557_v9  ;;  %v2273_v12 = vadd.f32 %v2226_v18, %v2034_v13  ;;  %v1988_v3 = vsel %vm1843_vm4, %v3874_v1, 0.0  ;;  %v1511_v23 = vsel %vm1366_vm8, %v3862_v11, 0.0 }
  0xf5   :  { %2558 = vst [vmem:[#allocation2 + $0xa] sm:$0x3] %v2511_v5  ;;  %vm1605_vm9 = vcmp.eq.s32.totalorder %v1091_v49, 1  ;;  %v2465_v8 = vsel %vm2320_vm5, %v3880_v42, 0.0  ;;  %v1558_v48 = vadd.f32 %v1511_v23, %v3626_v24  ;;  %vm1844_vm10 = vcmp.eq.s32.totalorder %v1091_v49, 2  ;;  %v1105_v24 = vpop.permute.xlu1 %1104 }
  0xf6   :  { %v2035_v63 = vadd.f32 %v1988_v3, %v1796_v19  ;;  %v2512_v26 = vadd.f32 %v2465_v8, %v2273_v12  ;;  %v2227_v4 = vsel %vm2082_vm6, %v3877_v40, 0.0  ;;  %v2466_v32 = vsel %vm2321_vm7, %v3880_v42, 0.0  ;;  %v1112_v56 = vpop.permute.xlu0 %1111 }
  0xf7   :  { %v1750_v36 = vsel %vm1605_vm9, %v3870_v55, 0.0  ;;  %vm2083_vm11 = vcmp.eq.s32.totalorder %v1091_v49, 3  ;;  %vm2322_vm12 = vcmp.eq.s32.totalorder %v1091_v49, 4  ;;  %v1989_v0 = vsel %vm1844_vm10, %v3874_v1, 0.0 }
  0xf8   :  { %v2274_v47 = vadd.f32 %v2227_v4, %v2035_v63  ;;  %v1797_v17 = vadd.f32 %v1750_v36, %v1558_v48  ;;  %2559 = vst [vmem:[#allocation2 + $0xc] sm:$0x3] %v2512_v26  ;;  %vm1367_vm13 = vcmp.eq.s32.totalorder %v1098_v41, 0  ;;  %vm1606_vm14 = vcmp.eq.s32.totalorder %v1098_v41, 1 }
  0xf9   :  { %vm1845_vm15 = vcmp.eq.s32.totalorder %v1098_v41, 2  ;;  %v1512_v46 = vsel %vm1367_vm13, %v3862_v11, 0.0  ;;  %vm2084_vm0 = vcmp.eq.s32.totalorder %v1098_v41, 3  ;;  %v2228_v18 = vsel %vm2083_vm11, %v3877_v40, 0.0 }
  0xfa   :  { %v2513_v15 = vadd.f32 %v2466_v32, %v2274_v47  ;;  %v2036_v6 = vadd.f32 %v1989_v0, %v1797_v17  ;;  %v2467_v9 = vsel %vm2322_vm12, %v3880_v42, 0.0  ;;  %v1559_v5 = vadd.f32 %v1512_v46, %v3624_v25  ;;  %v1119_v17 = vpop.permute.xlu1 %1118 }
  0xfb   :  { %vm2323_vm1 = vcmp.eq.s32.totalorder %v1098_v41, 4  ;;  %v1751_v13 = vsel %vm1606_vm14, %v3870_v55, 0.0  ;;  %vm1368_vm2 = vcmp.eq.s32.totalorder %v1105_v24, 0  ;;  %vm1607_vm3 = vcmp.eq.s32.totalorder %v1105_v24, 1 }
  0xfc   :  { %2560 = vst [vmem:[#allocation2 + $0xe] sm:$0x3] %v2513_v15  ;;  %v2275_v49 = vadd.f32 %v2228_v18, %v2036_v6  ;;  %v1798_v19 = vadd.f32 %v1751_v13, %v1559_v5  ;;  %v1990_v12 = vsel %vm1845_vm15, %v3874_v1, 0.0  ;;  %v2229_v3 = vsel %vm2084_vm0, %v3877_v40, 0.0 }
  0xfd   :  { %v1513_v23 = vsel %vm1368_vm2, %v3862_v11, 0.0  ;;  %v2468_v63 = vsel %vm2323_vm1, %v3880_v42, 0.0  ;;  %vm1846_vm4 = vcmp.eq.s32.totalorder %v1105_v24, 2  ;;  %v1752_v26 = vsel %vm1607_vm3, %v3870_v55, 0.0 }
  0xfe   :  { %v2514_v8 = vadd.f32 %v2467_v9, %v2275_v49  ;;  %v1560_v25 = vadd.f32 %v1513_v23, %v3640_v54  ;;  %v2037_v48 = vadd.f32 %v1990_v12, %v1798_v19  ;;  %vm2085_vm5 = vcmp.eq.s32.totalorder %v1105_v24, 3 }
  0xff   :  { %vm1369_vm6 = vcmp.eq.s32.totalorder %v1112_v56, 0  ;;  %vm2324_vm7 = vcmp.eq.s32.totalorder %v1105_v24, 4  ;;  %vm1608_vm8 = vcmp.eq.s32.totalorder %v1112_v56, 1  ;;  %v1991_v36 = vsel %vm1846_vm4, %v3874_v1, 0.0 }
 0x100   :  { %2561 = vst [vmem:[#allocation2 + $0x10] sm:$0x3] %v2514_v8  ;;  %v1799_v4 = vadd.f32 %v1752_v26, %v1560_v25  ;;  %v1514_v41 = vsel %vm1369_vm6, %v3862_v11, 0.0  ;;  %v2276_v32 = vadd.f32 %v2229_v3, %v2037_v48  ;;  %vm1847_vm9 = vcmp.eq.s32.totalorder %v1112_v56, 2  ;;  %v1133_v8 = vpop.permute.xlu1 %1132 }
 0x101   :  { %v1561_v47 = vadd.f32 %v1514_v41, %v3638_v53  ;;  %v1753_v0 = vsel %vm1608_vm8, %v3870_v55, 0.0  ;;  %vm2086_vm10 = vcmp.eq.s32.totalorder %v1112_v56, 3  ;;  %vm2325_vm11 = vcmp.eq.s32.totalorder %v1112_v56, 4  ;;  %v1126_v53 = vpop.permute.xlu0 %1125 }
 0x102   :  { %v2038_v54 = vadd.f32 %v1991_v36, %v1799_v4  ;;  %v2515_v15 = vadd.f32 %v2468_v63, %v2276_v32  ;;  %v2230_v6 = vsel %vm2085_vm5, %v3877_v40, 0.0  ;;  %v2469_v46 = vsel %vm2324_vm7, %v3880_v42, 0.0 }
 0x103   :  { %v1800_v18 = vadd.f32 %v1753_v0, %v1561_v47  ;;  %v1992_v5 = vsel %vm1847_vm9, %v3874_v1, 0.0  ;;  %vm1370_vm12 = vcmp.eq.s32.totalorder %v1119_v17, 0  ;;  %vm1609_vm13 = vcmp.eq.s32.totalorder %v1119_v17, 1 }
 0x104   :  { %v2277_v9 = vadd.f32 %v2230_v6, %v2038_v54  ;;  %2562 = vst [vmem:[#allocation2 + $0x12] sm:$0x3] %v2515_v15  ;;  %v2231_v13 = vsel %vm2086_vm10, %v3877_v40, 0.0  ;;  %v2470_v19 = vsel %vm2325_vm11, %v3880_v42, 0.0  ;;  %v1515_v56 = vsel %vm1370_vm12, %v3862_v11, 0.0 }
 0x105   :  { %v2039_v49 = vadd.f32 %v1992_v5, %v1800_v18  ;;  %v1562_v24 = vadd.f32 %v1515_v56, %v3655_v10  ;;  %vm1848_vm14 = vcmp.eq.s32.totalorder %v1119_v17, 2  ;;  %vm2087_vm15 = vcmp.eq.s32.totalorder %v1119_v17, 3  ;;  %v1140_v6 = vpop.permute.xlu0 %1139 }
 0x106   :  { %v2516_v12 = vadd.f32 %v2469_v46, %v2277_v9  ;;  %v1754_v23 = vsel %vm1609_vm13, %v3870_v55, 0.0  ;;  %vm2326_vm0 = vcmp.eq.s32.totalorder %v1119_v17, 4  ;;  %vm1371_vm1 = vcmp.eq.s32.totalorder %v1126_v53, 0 }
 0x107   :  { %v2278_v3 = vadd.f32 %v2231_v13, %v2039_v49  ;;  %v1801_v63 = vadd.f32 %v1754_v23, %v1562_v24  ;;  %v1516_v25 = vsel %vm1371_vm1, %v3862_v11, 0.0  ;;  %vm1610_vm2 = vcmp.eq.s32.totalorder %v1126_v53, 1  ;;  %v3986_v23 = vld [vmem:[%s4332_s5 + $0x8] sm:$0xff] }
 0x108   :  { %2563 = vst [vmem:[#allocation2 + $0x14] sm:$0x3] %v2516_v12  ;;  %vm1849_vm3 = vcmp.eq.s32.totalorder %v1126_v53, 2  ;;  %v1993_v26 = vsel %vm1848_vm14, %v3874_v1, 0.0  ;;  %v2232_v4 = vsel %vm2087_vm15, %v3877_v40, 0.0  ;;  %v1563_v10 = vadd.f32 %v1516_v25, %v3653_v39 }
 0x109   :  { %v2517_v48 = vadd.f32 %v2470_v19, %v2278_v3  ;;  %v2040_v41 = vadd.f32 %v1993_v26, %v1801_v63  ;;  %v2471_v32 = vsel %vm2326_vm0, %v3880_v42, 0.0  ;;  %v1755_v36 = vsel %vm1610_vm2, %v3870_v55, 0.0  ;;  %v1147_v19 = vpop.permute.xlu1 %1146  ;;  %v3981_v3 = vld [vmem:[%s4332_s5] sm:$0xff]  ;;  %v3999_v26 = vld [vmem:[%s4332_s5 + $0x18] sm:$0xff] }
 0x10a   :  { %vm1372_vm4 = vcmp.eq.s32.totalorder %v1133_v8, 0  ;;  %v1802_v47 = vadd.f32 %v1755_v36, %v1563_v10  ;;  %v1994_v17 = vsel %vm1849_vm3, %v3874_v1, 0.0  ;;  %vm2088_vm5 = vcmp.eq.s32.totalorder %v1126_v53, 3 }
 0x10b   :  { %2564 = vst [vmem:[#allocation2 + $0x16] sm:$0x3] %v2517_v48  ;;  %v1517_v54 = vsel %vm1372_vm4, %v3862_v11, 0.0  ;;  %v2279_v0 = vadd.f32 %v2232_v4, %v2040_v41  ;;  %vm1611_vm6 = vcmp.eq.s32.totalorder %v1133_v8, 1  ;;  %vm1850_vm7 = vcmp.eq.s32.totalorder %v1133_v8, 2 }
 0x10c   :  { %v1564_v15 = vadd.f32 %v1517_v54, %v3673_v35  ;;  %v2041_v39 = vadd.f32 %v1994_v17, %v1802_v47  ;;  %vm2327_vm8 = vcmp.eq.s32.totalorder %v1126_v53, 4  ;;  %v1756_v46 = vsel %vm1611_vm6, %v3870_v55, 0.0  ;;  %v3991_v53 = vld [vmem:[%s4332_s5 + $0x10] sm:$0xff] }
 0x10d   :  { %vm2089_vm9 = vcmp.eq.s32.totalorder %v1133_v8, 3  ;;  %v2518_v18 = vadd.f32 %v2471_v32, %v2279_v0  ;;  %v2233_v9 = vsel %vm2088_vm5, %v3877_v40, 0.0  ;;  %vm2328_vm10 = vcmp.eq.s32.totalorder %v1133_v8, 4  ;;  %v1154_v32 = vpop.permute.xlu0 %1153 }
 0x10e   :  { %v1803_v5 = vadd.f32 %v1756_v46, %v1564_v15  ;;  %v2280_v49 = vadd.f32 %v2233_v9, %v2041_v39  ;;  %v1995_v13 = vsel %vm1850_vm7, %v3874_v1, 0.0  ;;  %vm1373_vm11 = vcmp.eq.s32.totalorder %v1140_v6, 0  ;;  %v1161_v39 = vpop.permute.xlu1 %1160 }
 0x10f   :  { %vm1612_vm12 = vcmp.eq.s32.totalorder %v1140_v6, 1  ;;  %2565 = vst [vmem:[#allocation2 + $0x18] sm:$0x3] %v2518_v18  ;;  %v2472_v35 = vsel %vm2327_vm8, %v3880_v42, 0.0  ;;  %v2234_v12 = vsel %vm2089_vm9, %v3877_v40, 0.0  ;;  %v1518_v24 = vsel %vm1373_vm11, %v3862_v11, 0.0 }
 0x110   :  { %v2042_v56 = vadd.f32 %v1995_v13, %v1803_v5  ;;  %v2519_v63 = vadd.f32 %v2472_v35, %v2280_v49  ;;  %v2473_v25 = vsel %vm2328_vm10, %v3880_v42, 0.0  ;;  %v1565_v48 = vadd.f32 %v1518_v24, %v3671_v34 }
 0x111   :  { %vm1851_vm13 = vcmp.eq.s32.totalorder %v1140_v6, 2  ;;  %v1757_v10 = vsel %vm1612_vm12, %v3870_v55, 0.0  ;;  %vm2090_vm14 = vcmp.eq.s32.totalorder %v1140_v6, 3  ;;  %vm1374_vm15 = vcmp.eq.s32.totalorder %v1147_v19, 0  ;;  %v1168_v24 = vpop.permute.xlu0 %1167 }
 0x112   :  { %v2281_v4 = vadd.f32 %v2234_v12, %v2042_v56  ;;  %2566 = vst [vmem:[#allocation2 + $0x1a] sm:$0x3] %v2519_v63  ;;  %v1804_v41 = vadd.f32 %v1757_v10, %v1565_v48  ;;  %vm2329_vm0 = vcmp.eq.s32.totalorder %v1140_v6, 4  ;;  %v1519_v8 = vsel %vm1374_vm15, %v3862_v11, 0.0 }
 0x113   :  { %vm1613_vm1 = vcmp.eq.s32.totalorder %v1147_v19, 1  ;;  %v1996_v36 = vsel %vm1851_vm13, %v3874_v1, 0.0  ;;  %v1566_v47 = vadd.f32 %v1519_v8, %v3688_v59  ;;  %vm1852_vm2 = vcmp.eq.s32.totalorder %v1147_v19, 2 }
 0x114   :  { %v2520_v34 = vadd.f32 %v2473_v25, %v2281_v4  ;;  %v2043_v17 = vadd.f32 %v1996_v36, %v1804_v41  ;;  %v2235_v54 = vsel %vm2090_vm14, %v3877_v40, 0.0  ;;  %v1758_v0 = vsel %vm1613_vm1, %v3870_v55, 0.0 }
 0x115   :  { %vm2091_vm3 = vcmp.eq.s32.totalorder %v1147_v19, 3  ;;  %v2474_v15 = vsel %vm2329_vm0, %v3880_v42, 0.0  ;;  %v1805_v6 = vadd.f32 %v1758_v0, %v1566_v47  ;;  %vm2330_vm4 = vcmp.eq.s32.totalorder %v1147_v19, 4 }
 0x116   :  { %2567 = vst [vmem:[#allocation2 + $0x1c] sm:$0x3] %v2520_v34  ;;  %vm1375_vm5 = vcmp.eq.s32.totalorder %v1154_v32, 0  ;;  %v2282_v46 = vadd.f32 %v2235_v54, %v2043_v17  ;;  %v1997_v18 = vsel %vm1852_vm2, %v3874_v1, 0.0  ;;  %vm1614_vm6 = vcmp.eq.s32.totalorder %v1154_v32, 1  ;;  %v1175_v17 = vpop.permute.xlu1 %1174 }
 0x117   :  { %v1520_v9 = vsel %vm1375_vm5, %v3862_v11, 0.0  ;;  %v2044_v59 = vadd.f32 %v1997_v18, %v1805_v6  ;;  %v2236_v5 = vsel %vm2091_vm3, %v3877_v40, 0.0  ;;  %vm1853_vm7 = vcmp.eq.s32.totalorder %v1154_v32, 2 }
 0x118   :  { %v1567_v49 = vadd.f32 %v1520_v9, %v3686_v14  ;;  %v2521_v13 = vadd.f32 %v2474_v15, %v2282_v46  ;;  %v2475_v35 = vsel %vm2330_vm4, %v3880_v42, 0.0  ;;  %v1759_v56 = vsel %vm1614_vm6, %v3870_v55, 0.0 }
 0x119   :  { %vm1376_vm8 = vcmp.eq.s32.totalorder %v1161_v39, 0  ;;  %v2283_v19 = vadd.f32 %v2236_v5, %v2044_v59  ;;  %vm2092_vm9 = vcmp.eq.s32.totalorder %v1154_v32, 3  ;;  %vm2331_vm10 = vcmp.eq.s32.totalorder %v1154_v32, 4 }
 0x11a   :  { %v1806_v12 = vadd.f32 %v1759_v56, %v1567_v49  ;;  %2568 = vst [vmem:[#allocation2 + $0x1e] sm:$0x3] %v2521_v13  ;;  %v1998_v63 = vsel %vm1853_vm7, %v3874_v1, 0.0  ;;  %v1521_v25 = vsel %vm1376_vm8, %v3862_v11, 0.0  ;;  %vm1615_vm11 = vcmp.eq.s32.totalorder %v1161_v39, 1 }
 0x11b   :  { %vm1854_vm12 = vcmp.eq.s32.totalorder %v1161_v39, 2  ;;  %v2522_v14 = vadd.f32 %v2475_v35, %v2283_v19  ;;  %v1568_v4 = vadd.f32 %v1521_v25, %v3701_v28  ;;  %vm2093_vm13 = vcmp.eq.s32.totalorder %v1161_v39, 3 }
 0x11c   :  { %v2045_v48 = vadd.f32 %v1998_v63, %v1806_v12  ;;  %v2237_v10 = vsel %vm2092_vm9, %v3877_v40, 0.0  ;;  %v2476_v41 = vsel %vm2331_vm10, %v3880_v42, 0.0  ;;  %v1760_v8 = vsel %vm1615_vm11, %v3870_v55, 0.0 }
 0x11d   :  { %vm1377_vm14 = vcmp.eq.s32.totalorder %v1168_v24, 0  ;;  %2569 = vst [vmem:[#allocation2 + $0x20] sm:$0x3] %v2522_v14  ;;  %v1807_v34 = vadd.f32 %v1760_v8, %v1568_v4  ;;  %v1999_v36 = vsel %vm1854_vm12, %v3874_v1, 0.0  ;;  %v2238_v54 = vsel %vm2093_vm13, %v3877_v40, 0.0 }
 0x11e   :  { %v2284_v32 = vadd.f32 %v2237_v10, %v2045_v48  ;;  %v1522_v47 = vsel %vm1377_vm14, %v3862_v11, 0.0  ;;  %vm1616_vm15 = vcmp.eq.s32.totalorder %v1168_v24, 1  ;;  %vm1855_vm0 = vcmp.eq.s32.totalorder %v1168_v24, 2 }
 0x11f   :  { %v1569_v28 = vadd.f32 %v1522_v47, %v3699_v43  ;;  %v2046_v15 = vadd.f32 %v1999_v36, %v1807_v34  ;;  %vm2332_vm1 = vcmp.eq.s32.totalorder %v1161_v39, 4  ;;  %v1761_v6 = vsel %vm1616_vm15, %v3870_v55, 0.0  ;;  %v1182_v39 = vpop.permute.xlu0 %1181 }
 0x120   :  { %v2523_v0 = vadd.f32 %v2476_v41, %v2284_v32  ;;  %vm2094_vm2 = vcmp.eq.s32.totalorder %v1168_v24, 3  ;;  %vm2333_vm3 = vcmp.eq.s32.totalorder %v1168_v24, 4  ;;  %vm1378_vm4 = vcmp.eq.s32.totalorder %v1175_v17, 0 }
 0x121   :  { %v1808_v46 = vadd.f32 %v1761_v6, %v1569_v28  ;;  %v2285_v18 = vadd.f32 %v2238_v54, %v2046_v15  ;;  %v2000_v9 = vsel %vm1855_vm0, %v3874_v1, 0.0  ;;  %v1523_v59 = vsel %vm1378_vm4, %v3862_v11, 0.0 }
 0x122   :  { %2570 = vst [vmem:[#allocation2 + $0x22] sm:$0x3] %v2523_v0  ;;  %vm1617_vm5 = vcmp.eq.s32.totalorder %v1175_v17, 1  ;;  %v2477_v43 = vsel %vm2332_vm1, %v3880_v42, 0.0  ;;  %v1570_v49 = vadd.f32 %v1523_v59, %v3715_v58  ;;  %vm1856_vm6 = vcmp.eq.s32.totalorder %v1175_v17, 2  ;;  %v1189_v58 = vpop.permute.xlu1 %1188 }
 0x123   :  { %v2047_v5 = vadd.f32 %v2000_v9, %v1808_v46  ;;  %v2524_v13 = vadd.f32 %v2477_v43, %v2285_v18  ;;  %v2239_v35 = vsel %vm2094_vm2, %v3877_v40, 0.0  ;;  %v2478_v56 = vsel %vm2333_vm3, %v3880_v42, 0.0  ;;  %v1196_v34 = vpop.permute.xlu0 %1195 }
 0x124   :  { %v1762_v19 = vsel %vm1617_vm5, %v3870_v55, 0.0  ;;  %vm2095_vm7 = vcmp.eq.s32.totalorder %v1175_v17, 3  ;;  %vm2334_vm8 = vcmp.eq.s32.totalorder %v1175_v17, 4  ;;  %v2001_v63 = vsel %vm1856_vm6, %v3874_v1, 0.0 }
 0x125   :  { %v2286_v12 = vadd.f32 %v2239_v35, %v2047_v5  ;;  %v1809_v24 = vadd.f32 %v1762_v19, %v1570_v49  ;;  %2571 = vst [vmem:[#allocation2 + $0x24] sm:$0x3] %v2524_v13  ;;  %vm1379_vm9 = vcmp.eq.s32.totalorder %v1182_v39, 0  ;;  %vm1618_vm10 = vcmp.eq.s32.totalorder %v1182_v39, 1 }
 0x126   :  { %vm1857_vm11 = vcmp.eq.s32.totalorder %v1182_v39, 2  ;;  %v1524_v48 = vsel %vm1379_vm9, %v3862_v11, 0.0  ;;  %vm2096_vm12 = vcmp.eq.s32.totalorder %v1182_v39, 3  ;;  %v2240_v4 = vsel %vm2095_vm7, %v3877_v40, 0.0  ;;  %v1203_v5 = vpop.permute.xlu1 %1202 }
 0x127   :  { %v2525_v25 = vadd.f32 %v2478_v56, %v2286_v12  ;;  %v2048_v14 = vadd.f32 %v2001_v63, %v1809_v24  ;;  %v2479_v10 = vsel %vm2334_vm8, %v3880_v42, 0.0  ;;  %v1571_v41 = vadd.f32 %v1524_v48, %v3713_v57 }
 0x128   :  { %vm2335_vm13 = vcmp.eq.s32.totalorder %v1182_v39, 4  ;;  %v1763_v32 = vsel %vm1618_vm10, %v3870_v55, 0.0  ;;  %vm1380_vm14 = vcmp.eq.s32.totalorder %v1189_v58, 0  ;;  %vm1619_vm15 = vcmp.eq.s32.totalorder %v1189_v58, 1 }
 0x129   :  { %2572 = vst [vmem:[#allocation2 + $0x26] sm:$0x3] %v2525_v25  ;;  %v2287_v8 = vadd.f32 %v2240_v4, %v2048_v14  ;;  %v1810_v36 = vadd.f32 %v1763_v32, %v1571_v41  ;;  %v2002_v47 = vsel %vm1857_vm11, %v3874_v1, 0.0  ;;  %v2241_v17 = vsel %vm2096_vm12, %v3877_v40, 0.0 }
 0x12a   :  { %v1525_v54 = vsel %vm1380_vm14, %v3862_v11, 0.0  ;;  %v2480_v0 = vsel %vm2335_vm13, %v3880_v42, 0.0  ;;  %vm1858_vm0 = vcmp.eq.s32.totalorder %v1189_v58, 2  ;;  %v1764_v6 = vsel %vm1619_vm15, %v3870_v55, 0.0  ;;  %v1217_v41 = vpop.permute.xlu1 %1216 }
 0x12b   :  { %v2526_v28 = vadd.f32 %v2479_v10, %v2287_v8  ;;  %v1572_v57 = vadd.f32 %v1525_v54, %v3729_v22  ;;  %v2049_v15 = vadd.f32 %v2002_v47, %v1810_v36  ;;  %vm2097_vm1 = vcmp.eq.s32.totalorder %v1189_v58, 3 }
 0x12c   :  { %vm1381_vm2 = vcmp.eq.s32.totalorder %v1196_v34, 0  ;;  %vm2336_vm3 = vcmp.eq.s32.totalorder %v1189_v58, 4  ;;  %vm1620_vm4 = vcmp.eq.s32.totalorder %v1196_v34, 1  ;;  %v2003_v59 = vsel %vm1858_vm0, %v3874_v1, 0.0 }
 0x12d   :  { %2573 = vst [vmem:[#allocation2 + $0x28] sm:$0x3] %v2526_v28  ;;  %v1811_v46 = vadd.f32 %v1764_v6, %v1572_v57  ;;  %v1526_v18 = vsel %vm1381_vm2, %v3862_v11, 0.0  ;;  %v2288_v9 = vadd.f32 %v2241_v17, %v2049_v15  ;;  %vm1859_vm5 = vcmp.eq.s32.totalorder %v1196_v34, 2 }
 0x12e   :  { %v1573_v43 = vadd.f32 %v1526_v18, %v3727_v21  ;;  %v1765_v49 = vsel %vm1620_vm4, %v3870_v55, 0.0  ;;  %vm2098_vm6 = vcmp.eq.s32.totalorder %v1196_v34, 3  ;;  %vm2337_vm7 = vcmp.eq.s32.totalorder %v1196_v34, 4  ;;  %v1210_v21 = vpop.permute.xlu0 %1209 }
 0x12f   :  { %v2050_v22 = vadd.f32 %v2003_v59, %v1811_v46  ;;  %v2527_v39 = vadd.f32 %v2480_v0, %v2288_v9  ;;  %v2242_v13 = vsel %vm2097_vm1, %v3877_v40, 0.0  ;;  %v2481_v35 = vsel %vm2336_vm3, %v3880_v42, 0.0 }
 0x130   :  { %v1812_v56 = vadd.f32 %v1765_v49, %v1573_v43  ;;  %v2004_v12 = vsel %vm1859_vm5, %v3874_v1, 0.0  ;;  %vm1382_vm8 = vcmp.eq.s32.totalorder %v1203_v5, 0  ;;  %vm1621_vm9 = vcmp.eq.s32.totalorder %v1203_v5, 1 }
 0x131   :  { %v2289_v19 = vadd.f32 %v2242_v13, %v2050_v22  ;;  %2574 = vst [vmem:[#allocation2 + $0x2a] sm:$0x3] %v2527_v39  ;;  %v2243_v63 = vsel %vm2098_vm6, %v3877_v40, 0.0  ;;  %v2482_v25 = vsel %vm2337_vm7, %v3880_v42, 0.0  ;;  %v1527_v14 = vsel %vm1382_vm8, %v3862_v11, 0.0  ;;  %v1231_v39 = vpop.permute.xlu1 %1230 }
 0x132   :  { %v2051_v24 = vadd.f32 %v2004_v12, %v1812_v56  ;;  %v1574_v58 = vadd.f32 %v1527_v14, %v3741_v45  ;;  %vm1860_vm10 = vcmp.eq.s32.totalorder %v1203_v5, 2  ;;  %vm2099_vm11 = vcmp.eq.s32.totalorder %v1203_v5, 3  ;;  %v1224_v18 = vpop.permute.xlu0 %1223 }
 0x133   :  { %v2528_v48 = vadd.f32 %v2481_v35, %v2289_v19  ;;  %v1766_v10 = vsel %vm1621_vm9, %v3870_v55, 0.0  ;;  %vm2338_vm12 = vcmp.eq.s32.totalorder %v1203_v5, 4  ;;  %vm1383_vm13 = vcmp.eq.s32.totalorder %v1210_v21, 0 }
 0x134   :  { %v2290_v4 = vadd.f32 %v2243_v63, %v2051_v24  ;;  %v1813_v8 = vadd.f32 %v1766_v10, %v1574_v58  ;;  %v1528_v32 = vsel %vm1383_vm13, %v3862_v11, 0.0  ;;  %vm1622_vm14 = vcmp.eq.s32.totalorder %v1210_v21, 1 }
 0x135   :  { %2575 = vst [vmem:[#allocation2 + $0x2c] sm:$0x3] %v2528_v48  ;;  %vm1861_vm15 = vcmp.eq.s32.totalorder %v1210_v21, 2  ;;  %v2005_v36 = vsel %vm1860_vm10, %v3874_v1, 0.0  ;;  %v2244_v47 = vsel %vm2099_vm11, %v3877_v40, 0.0  ;;  %v1575_v45 = vadd.f32 %v1528_v32, %v3739_v44 }
 0x136   :  { %v2529_v34 = vadd.f32 %v2482_v25, %v2290_v4  ;;  %v2052_v17 = vadd.f32 %v2005_v36, %v1813_v8  ;;  %v2483_v54 = vsel %vm2338_vm12, %v3880_v42, 0.0  ;;  %v1767_v28 = vsel %vm1622_vm14, %v3870_v55, 0.0  ;;  %v1238_v48 = vpop.permute.xlu0 %1237  ;;  %v1245_v36 = vpop.permute.xlu1 %1244 }
 0x137   :  { %vm1384_vm0 = vcmp.eq.s32.totalorder %v1217_v41, 0  ;;  %v1814_v0 = vadd.f32 %v1767_v28, %v1575_v45  ;;  %v2006_v57 = vsel %vm1861_vm15, %v3874_v1, 0.0  ;;  %vm2100_vm1 = vcmp.eq.s32.totalorder %v1210_v21, 3 }
 0x138   :  { %2576 = vst [vmem:[#allocation2 + $0x2e] sm:$0x3] %v2529_v34  ;;  %v1529_v15 = vsel %vm1384_vm0, %v3862_v11, 0.0  ;;  %v2291_v6 = vadd.f32 %v2244_v47, %v2052_v17  ;;  %vm1623_vm2 = vcmp.eq.s32.totalorder %v1217_v41, 1  ;;  %vm1862_vm3 = vcmp.eq.s32.totalorder %v1217_v41, 2 }
 0x139   :  { %v1576_v46 = vadd.f32 %v1529_v15, %v3758_v30  ;;  %v2053_v44 = vadd.f32 %v2006_v57, %v1814_v0  ;;  %vm2339_vm4 = vcmp.eq.s32.totalorder %v1210_v21, 4  ;;  %v1768_v9 = vsel %vm1623_vm2, %v3870_v55, 0.0 }
 0x13a   :  { %vm2101_vm5 = vcmp.eq.s32.totalorder %v1217_v41, 3  ;;  %v2530_v59 = vadd.f32 %v2483_v54, %v2291_v6  ;;  %v2245_v43 = vsel %vm2100_vm1, %v3877_v40, 0.0  ;;  %vm2340_vm6 = vcmp.eq.s32.totalorder %v1217_v41, 4 }
 0x13b   :  { %v1815_v5 = vadd.f32 %v1768_v9, %v1576_v46  ;;  %v2292_v22 = vadd.f32 %v2245_v43, %v2053_v44  ;;  %v2007_v49 = vsel %vm1862_vm3, %v3874_v1, 0.0  ;;  %vm1385_vm7 = vcmp.eq.s32.totalorder %v1224_v18, 0 }
 0x13c   :  { %vm1624_vm8 = vcmp.eq.s32.totalorder %v1224_v18, 1  ;;  %2577 = vst [vmem:[#allocation2 + $0x30] sm:$0x3] %v2530_v59  ;;  %v2484_v30 = vsel %vm2339_vm4, %v3880_v42, 0.0  ;;  %v2246_v35 = vsel %vm2101_vm5, %v3877_v40, 0.0  ;;  %v1530_v56 = vsel %vm1385_vm7, %v3862_v11, 0.0 }
 0x13d   :  { %v2054_v13 = vadd.f32 %v2007_v49, %v1815_v5  ;;  %v2531_v19 = vadd.f32 %v2484_v30, %v2292_v22  ;;  %v2485_v12 = vsel %vm2340_vm6, %v3880_v42, 0.0  ;;  %v1577_v21 = vadd.f32 %v1530_v56, %v3756_v27  ;;  %v1259_v56 = vpop.permute.xlu1 %1258 }
 0x13e   :  { %vm1863_vm9 = vcmp.eq.s32.totalorder %v1224_v18, 2  ;;  %v1769_v63 = vsel %vm1624_vm8, %v3870_v55, 0.0  ;;  %vm2102_vm10 = vcmp.eq.s32.totalorder %v1224_v18, 3  ;;  %vm1386_vm11 = vcmp.eq.s32.totalorder %v1231_v39, 0 }
 0x13f   :  { %v2293_v24 = vadd.f32 %v2246_v35, %v2054_v13  ;;  %2578 = vst [vmem:[#allocation2 + $0x32] sm:$0x3] %v2531_v19  ;;  %v1816_v25 = vadd.f32 %v1769_v63, %v1577_v21  ;;  %vm2341_vm12 = vcmp.eq.s32.totalorder %v1224_v18, 4  ;;  %v1531_v14 = vsel %vm1386_vm11, %v3862_v11, 0.0  ;;  %v1252_v18 = vpop.permute.xlu0 %1251 }
 0x140   :  { %vm1625_vm13 = vcmp.eq.s32.totalorder %v1231_v39, 1  ;;  %v2008_v4 = vsel %vm1863_vm9, %v3874_v1, 0.0  ;;  %v1578_v10 = vadd.f32 %v1531_v14, %v3775_v2  ;;  %vm1864_vm14 = vcmp.eq.s32.totalorder %v1231_v39, 2 }
 0x141   :  { %v2532_v58 = vadd.f32 %v2485_v12, %v2293_v24  ;;  %v2055_v27 = vadd.f32 %v2008_v4, %v1816_v25  ;;  %v2247_v41 = vsel %vm2102_vm10, %v3877_v40, 0.0  ;;  %v1770_v8 = vsel %vm1625_vm13, %v3870_v55, 0.0 }
 0x142   :  { %vm2103_vm15 = vcmp.eq.s32.totalorder %v1231_v39, 3  ;;  %v2486_v32 = vsel %vm2341_vm12, %v3880_v42, 0.0  ;;  %v1817_v34 = vadd.f32 %v1770_v8, %v1578_v10  ;;  %vm2342_vm0 = vcmp.eq.s32.totalorder %v1231_v39, 4 }
 0x143   :  { %2579 = vst [vmem:[#allocation2 + $0x34] sm:$0x3] %v2532_v58  ;;  %vm1387_vm1 = vcmp.eq.s32.totalorder %v1238_v48, 0  ;;  %v2294_v47 = vadd.f32 %v2247_v41, %v2055_v27  ;;  %v2009_v45 = vsel %vm1864_vm14, %v3874_v1, 0.0  ;;  %vm1626_vm2 = vcmp.eq.s32.totalorder %v1238_v48, 1  ;;  %v1266_v10 = vpop.permute.xlu0 %1265 }
 0x144   :  { %v1532_v17 = vsel %vm1387_vm1, %v3862_v11, 0.0  ;;  %v2056_v2 = vadd.f32 %v2009_v45, %v1817_v34  ;;  %v2248_v54 = vsel %vm2103_vm15, %v3877_v40, 0.0  ;;  %vm1865_vm3 = vcmp.eq.s32.totalorder %v1238_v48, 2 }
 0x145   :  { %v1579_v28 = vadd.f32 %v1532_v17, %v3773_v61  ;;  %v2533_v0 = vadd.f32 %v2486_v32, %v2294_v47  ;;  %v2487_v57 = vsel %vm2342_vm0, %v3880_v42, 0.0  ;;  %v1771_v15 = vsel %vm1626_vm2, %v3870_v55, 0.0 }
 0x146   :  { %vm1388_vm4 = vcmp.eq.s32.totalorder %v1245_v36, 0  ;;  %v2295_v6 = vadd.f32 %v2248_v54, %v2056_v2  ;;  %vm2104_vm5 = vcmp.eq.s32.totalorder %v1238_v48, 3  ;;  %vm2343_vm6 = vcmp.eq.s32.totalorder %v1238_v48, 4 }
 0x147   :  { %v1818_v46 = vadd.f32 %v1771_v15, %v1579_v28  ;;  %2580 = vst [vmem:[#allocation2 + $0x36] sm:$0x3] %v2533_v0  ;;  %v2010_v44 = vsel %vm1865_vm3, %v3874_v1, 0.0  ;;  %v1533_v9 = vsel %vm1388_vm4, %v3862_v11, 0.0  ;;  %vm1627_vm7 = vcmp.eq.s32.totalorder %v1245_v36, 1  ;;  %v4346_v0 = vld [vmem:[#allocation5_spill] sm:$0xff] }
 0x148   :  { %vm1866_vm8 = vcmp.eq.s32.totalorder %v1245_v36, 2  ;;  %v2534_v61 = vadd.f32 %v2487_v57, %v2295_v6  ;;  %v1580_v43 = vadd.f32 %v1533_v9, %v3788_v33  ;;  %vm2105_vm9 = vcmp.eq.s32.totalorder %v1245_v36, 3 }
 0x149   :  { %v2057_v59 = vadd.f32 %v2010_v44, %v1818_v46  ;;  %v2249_v5 = vsel %vm2104_vm5, %v3877_v40, 0.0  ;;  %v2488_v22 = vsel %vm2343_vm6, %v3880_v42, 0.0  ;;  %v1772_v49 = vsel %vm1627_vm7, %v3870_v55, 0.0  ;;  %v1280_v46 = vpop.permute.xlu0 %1279 }
 0x14a   :  { %vm1389_vm10 = vcmp.eq.s32.totalorder %v1252_v18, 0  ;;  %2581 = vst [vmem:[#allocation2 + $0x38] sm:$0x3] %v2534_v61  ;;  %v1819_v30 = vadd.f32 %v1772_v49, %v1580_v43  ;;  %v2011_v13 = vsel %vm1866_vm8, %v3874_v1, 0.0  ;;  %v2250_v19 = vsel %vm2105_vm9, %v3877_v40, 0.0 }
 0x14b   :  { %v2296_v39 = vadd.f32 %v2249_v5, %v2057_v59  ;;  %v1534_v35 = vsel %vm1389_vm10, %v3862_v11, 0.0  ;;  %vm1628_vm11 = vcmp.eq.s32.totalorder %v1252_v18, 1  ;;  %vm1867_vm12 = vcmp.eq.s32.totalorder %v1252_v18, 2 }
 0x14c   :  { %v1581_v33 = vadd.f32 %v1534_v35, %v3786_v31  ;;  %v2058_v21 = vadd.f32 %v2011_v13, %v1819_v30  ;;  %vm2344_vm13 = vcmp.eq.s32.totalorder %v1245_v36, 4  ;;  %v1773_v24 = vsel %vm1628_vm11, %v3870_v55, 0.0 }
 0x14d   :  { %v2535_v12 = vadd.f32 %v2488_v22, %v2296_v39  ;;  %vm2106_vm14 = vcmp.eq.s32.totalorder %v1252_v18, 3  ;;  %vm2345_vm15 = vcmp.eq.s32.totalorder %v1252_v18, 4  ;;  %vm1390_vm0 = vcmp.eq.s32.totalorder %v1259_v56, 0 }
 0x14e   :  { %v1820_v63 = vadd.f32 %v1773_v24, %v1581_v33  ;;  %v2297_v25 = vadd.f32 %v2250_v19, %v2058_v21  ;;  %v2012_v14 = vsel %vm1867_vm12, %v3874_v1, 0.0  ;;  %v1535_v48 = vsel %vm1390_vm0, %v3862_v11, 0.0 }
 0x14f   :  { %2582 = vst [vmem:[#allocation2 + $0x3a] sm:$0x3] %v2535_v12  ;;  %vm1629_vm1 = vcmp.eq.s32.totalorder %v1259_v56, 1  ;;  %v2489_v31 = vsel %vm2344_vm13, %v3880_v42, 0.0  ;;  %v1582_v4 = vadd.f32 %v1535_v48, %v3801_v20  ;;  %vm1868_vm2 = vcmp.eq.s32.totalorder %v1259_v56, 2  ;;  %v1273_v20 = vpop.permute.xlu1 %1272 }
 0x150   :  { %v2059_v58 = vadd.f32 %v2012_v14, %v1820_v63  ;;  %v2536_v27 = vadd.f32 %v2489_v31, %v2297_v25  ;;  %v2251_v41 = vsel %vm2106_vm14, %v3877_v40, 0.0  ;;  %v2490_v8 = vsel %vm2345_vm15, %v3880_v42, 0.0 }
 0x151   :  { %v1774_v32 = vsel %vm1629_vm1, %v3870_v55, 0.0  ;;  %vm2107_vm3 = vcmp.eq.s32.totalorder %v1259_v56, 3  ;;  %vm2346_vm4 = vcmp.eq.s32.totalorder %v1259_v56, 4  ;;  %v2013_v47 = vsel %vm1868_vm2, %v3874_v1, 0.0 }
 0x152   :  { %v2298_v34 = vadd.f32 %v2251_v41, %v2059_v58  ;;  %v1821_v36 = vadd.f32 %v1774_v32, %v1582_v4  ;;  %2583 = vst [vmem:[#allocation2 + $0x3c] sm:$0x3] %v2536_v27  ;;  %vm1391_vm5 = vcmp.eq.s32.totalorder %v1266_v10, 0  ;;  %vm1630_vm6 = vcmp.eq.s32.totalorder %v1266_v10, 1 }
 0x153   :  { %vm1869_vm7 = vcmp.eq.s32.totalorder %v1266_v10, 2  ;;  %v1536_v2 = vsel %vm1391_vm5, %v3862_v11, 0.0  ;;  %vm2108_vm8 = vcmp.eq.s32.totalorder %v1266_v10, 3  ;;  %v2252_v54 = vsel %vm2107_vm3, %v3877_v40, 0.0  ;;  %v1287_v19 = vpop.permute.xlu1 %1286 }
 0x154   :  { %v2537_v45 = vadd.f32 %v2490_v8, %v2298_v34  ;;  %v2060_v17 = vadd.f32 %v2013_v47, %v1821_v36  ;;  %v2491_v28 = vsel %vm2346_vm4, %v3880_v42, 0.0  ;;  %v1583_v57 = vadd.f32 %v1536_v2, %v4346_v0 }
 0x155   :  { %vm2347_vm9 = vcmp.eq.s32.totalorder %v1266_v10, 4  ;;  %v1775_v6 = vsel %vm1630_vm6, %v3870_v55, 0.0  ;;  %vm1392_vm10 = vcmp.eq.s32.totalorder %v1273_v20, 0  ;;  %vm1631_vm11 = vcmp.eq.s32.totalorder %v1273_v20, 1 }
 0x156   :  { %2584 = vst [vmem:[#allocation2 + $0x3e] sm:$0x3] %v2537_v45  ;;  %v2299_v15 = vadd.f32 %v2252_v54, %v2060_v17  ;;  %v1822_v18 = vadd.f32 %v1775_v6, %v1583_v57  ;;  %v2014_v44 = vsel %vm1869_vm7, %v3874_v1, 0.0  ;;  %v2253_v9 = vsel %vm2108_vm8, %v3877_v40, 0.0 }
 0x157   :  { %v1537_v61 = vsel %vm1392_vm10, %v3862_v11, 0.0  ;;  %v2492_v43 = vsel %vm2347_vm9, %v3880_v42, 0.0  ;;  %vm1870_vm12 = vcmp.eq.s32.totalorder %v1273_v20, 2  ;;  %v1776_v49 = vsel %vm1631_vm11, %v3870_v55, 0.0  ;;  %v1301_v32 = vpop.permute.xlu1 %1300 }
 0x158   :  { %v2538_v59 = vadd.f32 %v2491_v28, %v2299_v15  ;;  %v1584_v5 = vadd.f32 %v1537_v61, %v3816_v37  ;;  %v2061_v22 = vadd.f32 %v2014_v44, %v1822_v18  ;;  %vm2109_vm13 = vcmp.eq.s32.totalorder %v1273_v20, 3 }
 0x159   :  { %vm1393_vm14 = vcmp.eq.s32.totalorder %v1280_v46, 0  ;;  %vm2348_vm15 = vcmp.eq.s32.totalorder %v1273_v20, 4  ;;  %vm1632_vm0 = vcmp.eq.s32.totalorder %v1280_v46, 1  ;;  %v2015_v35 = vsel %vm1870_vm12, %v3874_v1, 0.0 }
 0x15a   :  { %2585 = vst [vmem:[#allocation2 + $0x40] sm:$0x3] %v2538_v59  ;;  %v1823_v39 = vadd.f32 %v1776_v49, %v1584_v5  ;;  %v1538_v30 = vsel %vm1393_vm14, %v3862_v11, 0.0  ;;  %v2300_v13 = vadd.f32 %v2253_v9, %v2061_v22  ;;  %vm1871_vm1 = vcmp.eq.s32.totalorder %v1280_v46, 2 }
 0x15b   :  { %v1585_v56 = vadd.f32 %v1538_v30, %v3814_v62  ;;  %v1777_v33 = vsel %vm1632_vm0, %v3870_v55, 0.0  ;;  %vm2110_vm2 = vcmp.eq.s32.totalorder %v1280_v46, 3  ;;  %vm2349_vm3 = vcmp.eq.s32.totalorder %v1280_v46, 4  ;;  %v1294_v62 = vpop.permute.xlu0 %1293  ;;  %v1315_v49 = vpop.permute.xlu1 %1314 }
 0x15c   :  { %v2062_v37 = vadd.f32 %v2015_v35, %v1823_v39  ;;  %v2539_v12 = vadd.f32 %v2492_v43, %v2300_v13  ;;  %v2254_v21 = vsel %vm2109_vm13, %v3877_v40, 0.0  ;;  %v2493_v24 = vsel %vm2348_vm15, %v3880_v42, 0.0 }
 0x15d   :  { %v1824_v63 = vadd.f32 %v1777_v33, %v1585_v56  ;;  %v2016_v14 = vsel %vm1871_vm1, %v3874_v1, 0.0  ;;  %vm1394_vm4 = vcmp.eq.s32.totalorder %v1287_v19, 0  ;;  %vm1633_vm5 = vcmp.eq.s32.totalorder %v1287_v19, 1 }
 0x15e   :  { %v2301_v25 = vadd.f32 %v2254_v21, %v2062_v37  ;;  %2586 = vst [vmem:[#allocation2 + $0x42] sm:$0x3] %v2539_v12  ;;  %v2255_v31 = vsel %vm2110_vm2, %v3877_v40, 0.0  ;;  %v2494_v58 = vsel %vm2349_vm3, %v3880_v42, 0.0  ;;  %v1539_v4 = vsel %vm1394_vm4, %v3862_v11, 0.0 }
 0x15f   :  { %v2063_v48 = vadd.f32 %v2016_v14, %v1824_v63  ;;  %v1586_v27 = vadd.f32 %v1539_v4, %v3826_v29  ;;  %vm1872_vm6 = vcmp.eq.s32.totalorder %v1287_v19, 2  ;;  %vm2111_vm7 = vcmp.eq.s32.totalorder %v1287_v19, 3  ;;  %v4347_v29 = vld [vmem:[#allocation6_spill] sm:$0xff]  ;;  %v1308_v18 = vpop.permute.xlu0 %1307 }
 0x160   :  { %v2540_v10 = vadd.f32 %v2493_v24, %v2301_v25  ;;  %v1778_v8 = vsel %vm1633_vm5, %v3870_v55, 0.0  ;;  %vm2350_vm8 = vcmp.eq.s32.totalorder %v1287_v19, 4  ;;  %vm1395_vm9 = vcmp.eq.s32.totalorder %v1294_v62, 0  ;;  %v4348_v19 = vld [vmem:[#allocation7_spill] sm:$0xff] }
 0x161   :  { %v2302_v41 = vadd.f32 %v2255_v31, %v2063_v48  ;;  %v1825_v34 = vadd.f32 %v1778_v8, %v1586_v27  ;;  %v1540_v36 = vsel %vm1395_vm9, %v3862_v11, 0.0  ;;  %vm1634_vm10 = vcmp.eq.s32.totalorder %v1294_v62, 1 }
 0x162   :  { %2587 = vst [vmem:[#allocation2 + $0x44] sm:$0x3] %v2540_v10  ;;  %vm1873_vm11 = vcmp.eq.s32.totalorder %v1294_v62, 2  ;;  %v2017_v20 = vsel %vm1872_vm6, %v3874_v1, 0.0  ;;  %v2256_v45 = vsel %vm2111_vm7, %v3877_v40, 0.0  ;;  %v1587_v17 = vadd.f32 %v1540_v36, %v4347_v29 }
 0x163   :  { %v2541_v47 = vadd.f32 %v2494_v58, %v2302_v41  ;;  %v2064_v2 = vadd.f32 %v2017_v20, %v1825_v34  ;;  %v2495_v54 = vsel %vm2350_vm8, %v3880_v42, 0.0  ;;  %v1779_v28 = vsel %vm1634_vm10, %v3870_v55, 0.0  ;;  %v1322_v63 = vpop.permute.xlu0 %1321  ;;  %v1329_v41 = vpop.permute.xlu1 %1328 }
 0x164   :  { %vm1396_vm12 = vcmp.eq.s32.totalorder %v1301_v32, 0  ;;  %v1826_v0 = vadd.f32 %v1779_v28, %v1587_v17  ;;  %v2018_v57 = vsel %vm1873_vm11, %v3874_v1, 0.0  ;;  %vm2112_vm13 = vcmp.eq.s32.totalorder %v1294_v62, 3 }
 0x165   :  { %2588 = vst [vmem:[#allocation2 + $0x46] sm:$0x3] %v2541_v47  ;;  %v1541_v15 = vsel %vm1396_vm12, %v3862_v11, 0.0  ;;  %v2303_v6 = vadd.f32 %v2256_v45, %v2064_v2  ;;  %vm1635_vm14 = vcmp.eq.s32.totalorder %v1301_v32, 1  ;;  %vm1874_vm15 = vcmp.eq.s32.totalorder %v1301_v32, 2 }
 0x166   :  { %v1588_v46 = vadd.f32 %v1541_v15, %v3835_v7  ;;  %v2065_v44 = vadd.f32 %v2018_v57, %v1826_v0  ;;  %vm2351_vm0 = vcmp.eq.s32.totalorder %v1294_v62, 4  ;;  %v1780_v9 = vsel %vm1635_vm14, %v3870_v55, 0.0 }
 0x167   :  { %vm2113_vm1 = vcmp.eq.s32.totalorder %v1301_v32, 3  ;;  %v2542_v61 = vadd.f32 %v2495_v54, %v2303_v6  ;;  %v2257_v59 = vsel %vm2112_vm13, %v3877_v40, 0.0  ;;  %vm2352_vm2 = vcmp.eq.s32.totalorder %v1301_v32, 4  ;;  %v1336_v2 = vpop.permute.xlu0 %1335 }
 0x168   :  { %v1827_v43 = vadd.f32 %v1780_v9, %v1588_v46  ;;  %v2304_v5 = vadd.f32 %v2257_v59, %v2065_v44  ;;  %v2019_v22 = vsel %vm1874_vm15, %v3874_v1, 0.0  ;;  %vm1397_vm3 = vcmp.eq.s32.totalorder %v1308_v18, 0 }
 0x169   :  { %vm1636_vm4 = vcmp.eq.s32.totalorder %v1308_v18, 1  ;;  %2589 = vst [vmem:[#allocation2 + $0x48] sm:$0x3] %v2542_v61  ;;  %v2496_v7 = vsel %vm2351_vm0, %v3880_v42, 0.0  ;;  %v2258_v30 = vsel %vm2113_vm1, %v3877_v40, 0.0  ;;  %v1542_v13 = vsel %vm1397_vm3, %v3862_v11, 0.0  ;;  %v1343_v61 = vpop.permute.xlu1 %1342 }
 0x16a   :  { %v2066_v39 = vadd.f32 %v2019_v22, %v1827_v43  ;;  %v2543_v35 = vadd.f32 %v2496_v7, %v2304_v5  ;;  %v2497_v56 = vsel %vm2352_vm2, %v3880_v42, 0.0  ;;  %v1589_v37 = vadd.f32 %v1542_v13, %v4348_v19 }
 0x16b   :  { %vm1875_vm5 = vcmp.eq.s32.totalorder %v1308_v18, 2  ;;  %v1781_v12 = vsel %vm1636_vm4, %v3870_v55, 0.0  ;;  %vm2114_vm6 = vcmp.eq.s32.totalorder %v1308_v18, 3  ;;  %vm1398_vm7 = vcmp.eq.s32.totalorder %v1315_v49, 0  ;;  %v1350_v19 = vpop.permute.xlu0 %1349 }
 0x16c   :  { %v2305_v33 = vadd.f32 %v2258_v30, %v2066_v39  ;;  %2590 = vst [vmem:[#allocation2 + $0x4a] sm:$0x3] %v2543_v35  ;;  %v1828_v21 = vadd.f32 %v1781_v12, %v1589_v37  ;;  %vm2353_vm8 = vcmp.eq.s32.totalorder %v1308_v18, 4  ;;  %v1543_v24 = vsel %vm1398_vm7, %v3862_v11, 0.0 }
 0x16d   :  { %vm1637_vm9 = vcmp.eq.s32.totalorder %v1315_v49, 1  ;;  %v2020_v14 = vsel %vm1875_vm5, %v3874_v1, 0.0  ;;  %v1590_v62 = vadd.f32 %v1543_v24, %v3844_v16  ;;  %vm1876_vm10 = vcmp.eq.s32.totalorder %v1315_v49, 2 }
 0x16e   :  { %v2544_v25 = vadd.f32 %v2497_v56, %v2305_v33  ;;  %v2067_v48 = vadd.f32 %v2020_v14, %v1828_v21  ;;  %v2259_v31 = vsel %vm2114_vm6, %v3877_v40, 0.0  ;;  %v1782_v58 = vsel %vm1637_vm9, %v3870_v55, 0.0  ;;  %v1357_v14 = vpop.permute.xlu1 %1356 }
 0x16f   :  { %vm2115_vm11 = vcmp.eq.s32.totalorder %v1315_v49, 3  ;;  %v2498_v4 = vsel %vm2353_vm8, %v3880_v42, 0.0  ;;  %v1829_v10 = vadd.f32 %v1782_v58, %v1590_v62  ;;  %v2021_v27 = vsel %vm1876_vm10, %v3874_v1, 0.0 }
 0x170   :  { %2591 = vst [vmem:[#allocation2 + $0x4c] sm:$0x3] %v2544_v25  ;;  %vm1399_vm12 = vcmp.eq.s32.totalorder %v1322_v63, 0  ;;  %v2306_v8 = vadd.f32 %v2259_v31, %v2067_v48  ;;  %vm2354_vm13 = vcmp.eq.s32.totalorder %v1315_v49, 4  ;;  %vm1638_vm14 = vcmp.eq.s32.totalorder %v1322_v63, 1 }
 0x171   :  { %v1544_v32 = vsel %vm1399_vm12, %v3862_v11, 0.0  ;;  %v2068_v16 = vadd.f32 %v2021_v27, %v1829_v10  ;;  %v2260_v34 = vsel %vm2115_vm11, %v3877_v40, 0.0  ;;  %vm1877_vm15 = vcmp.eq.s32.totalorder %v1322_v63, 2 }
 0x172   :  { %v1591_v36 = vadd.f32 %v1544_v32, %v3842_v38  ;;  %v2545_v47 = vadd.f32 %v2498_v4, %v2306_v8  ;;  %v1783_v20 = vsel %vm1638_vm14, %v3870_v55, 0.0  ;;  %vm2116_vm0 = vcmp.eq.s32.totalorder %v1322_v63, 3 }
 0x173   :  { %vm1400_vm1 = vcmp.eq.s32.totalorder %v1329_v41, 0  ;;  %v2307_v45 = vadd.f32 %v2260_v34, %v2068_v16  ;;  %v2499_v29 = vsel %vm2354_vm13, %v3880_v42, 0.0  ;;  %vm2355_vm2 = vcmp.eq.s32.totalorder %v1322_v63, 4  ;;  %v4349_v34 = vld [vmem:[#allocation8_spill] sm:$0xff] }
 0x174   :  { %v1830_v17 = vadd.f32 %v1783_v20, %v1591_v36  ;;  %2592 = vst [vmem:[#allocation2 + $0x4e] sm:$0x3] %v2545_v47  ;;  %v2022_v54 = vsel %vm1877_vm15, %v3874_v1, 0.0  ;;  %v2261_v28 = vsel %vm2116_vm0, %v3877_v40, 0.0  ;;  %v1545_v0 = vsel %vm1400_vm1, %v3862_v11, 0.0 }
 0x175   :  { %vm1639_vm3 = vcmp.eq.s32.totalorder %v1329_v41, 1  ;;  %v2546_v38 = vadd.f32 %v2499_v29, %v2307_v45  ;;  %v1592_v15 = vadd.f32 %v1545_v0, %v3853_v60  ;;  %vm1878_vm4 = vcmp.eq.s32.totalorder %v1329_v41, 2 }
 0x176   :  { %v2069_v57 = vadd.f32 %v2022_v54, %v1830_v17  ;;  %v2500_v6 = vsel %vm2355_vm2, %v3880_v42, 0.0  ;;  %v1784_v46 = vsel %vm1639_vm3, %v3870_v55, 0.0  ;;  %vm2117_vm5 = vcmp.eq.s32.totalorder %v1329_v41, 3 }
 0x177   :  { %vm1401_vm6 = vcmp.eq.s32.totalorder %v1336_v2, 0  ;;  %2593 = vst [vmem:[#allocation2 + $0x50] sm:$0x3] %v2546_v38  ;;  %v1831_v44 = vadd.f32 %v1784_v46, %v1592_v15  ;;  %vm2356_vm7 = vcmp.eq.s32.totalorder %v1329_v41, 4  ;;  %v2023_v59 = vsel %vm1878_vm4, %v3874_v1, 0.0 }
 0x178   :  { %v2308_v18 = vadd.f32 %v2261_v28, %v2069_v57  ;;  %v1546_v9 = vsel %vm1401_vm6, %v3862_v11, 0.0  ;;  %vm1640_vm8 = vcmp.eq.s32.totalorder %v1336_v2, 1  ;;  %vm1879_vm9 = vcmp.eq.s32.totalorder %v1336_v2, 2 }
 0x179   :  { %v1593_v43 = vadd.f32 %v1546_v9, %v3851_v51  ;;  %v2070_v5 = vadd.f32 %v2023_v59, %v1831_v44  ;;  %v2262_v22 = vsel %vm2117_vm5, %v3877_v40, 0.0  ;;  %v1785_v49 = vsel %vm1640_vm8, %v3870_v55, 0.0 }
 0x17a   :  { %v2547_v60 = vadd.f32 %v2500_v6, %v2308_v18  ;;  %v2501_v7 = vsel %vm2356_vm7, %v3880_v42, 0.0  ;;  %vm2118_vm10 = vcmp.eq.s32.totalorder %v1336_v2, 3  ;;  %vm1402_vm11 = vcmp.eq.s32.totalorder %v1343_v61, 0 }
 0x17b   :  { %v1832_v39 = vadd.f32 %v1785_v49, %v1593_v43  ;;  %v2309_v30 = vadd.f32 %v2262_v22, %v2070_v5  ;;  %v2024_v13 = vsel %vm1879_vm9, %v3874_v1, 0.0  ;;  %v1547_v35 = vsel %vm1402_vm11, %v3862_v11, 0.0 }
 0x17c   :  { %2594 = vst [vmem:[#allocation2 + $0x52] sm:$0x3] %v2547_v60  ;;  %vm1641_vm12 = vcmp.eq.s32.totalorder %v1343_v61, 1  ;;  %vm2357_vm13 = vcmp.eq.s32.totalorder %v1336_v2, 4  ;;  %v1594_v56 = vadd.f32 %v1547_v35, %v3866_v52  ;;  %vm1880_vm14 = vcmp.eq.s32.totalorder %v1343_v61, 2 }
 0x17d   :  { %v2071_v51 = vadd.f32 %v2024_v13, %v1832_v39  ;;  %v2548_v37 = vadd.f32 %v2501_v7, %v2309_v30  ;;  %v2263_v33 = vsel %vm2118_vm10, %v3877_v40, 0.0  ;;  %v1786_v12 = vsel %vm1641_vm12, %v3870_v55, 0.0 }
 0x17e   :  { %v1833_v24 = vadd.f32 %v1786_v12, %v1594_v56  ;;  %vm2119_vm15 = vcmp.eq.s32.totalorder %v1343_v61, 3  ;;  %v2502_v63 = vsel %vm2357_vm13, %v3880_v42, 0.0  ;;  %v2025_v25 = vsel %vm1880_vm14, %v3874_v1, 0.0 }
 0x17f   :  { %v2310_v21 = vadd.f32 %v2263_v33, %v2071_v51  ;;  %2595 = vst [vmem:[#allocation2 + $0x54] sm:$0x3] %v2548_v37  ;;  %vm1403_vm0 = vcmp.eq.s32.totalorder %v1350_v19, 0  ;;  %vm1642_vm1 = vcmp.eq.s32.totalorder %v1350_v19, 1  ;;  %vm2358_vm2 = vcmp.eq.s32.totalorder %v1343_v61, 4 }
 0x180   :  { %v2072_v52 = vadd.f32 %v2025_v25, %v1833_v24  ;;  %v1548_v48 = vsel %vm1403_vm0, %v3862_v11, 0.0  ;;  %v2264_v31 = vsel %vm2119_vm15, %v3877_v40, 0.0  ;;  %vm1881_vm3 = vcmp.eq.s32.totalorder %v1350_v19, 2 }
 0x181   :  { %v2549_v62 = vadd.f32 %v2502_v63, %v2310_v21  ;;  %v1595_v58 = vadd.f32 %v1548_v48, %v3864_v50  ;;  %v1787_v10 = vsel %vm1642_vm1, %v3870_v55, 0.0  ;;  %vm1404_vm4 = vcmp.eq.s32.totalorder %v1357_v14, 0 }
 0x182   :  { %v2311_v4 = vadd.f32 %v2264_v31, %v2072_v52  ;;  %vm1643_vm5 = vcmp.eq.s32.totalorder %v1357_v14, 1  ;;  %v2503_v27 = vsel %vm2358_vm2, %v3880_v42, 0.0  ;;  %vm2120_vm6 = vcmp.eq.s32.totalorder %v1350_v19, 3 }
 0x183   :  { %2596 = vst [vmem:[#allocation2 + $0x56] sm:$0x3] %v2549_v62  ;;  %v1834_v41 = vadd.f32 %v1787_v10, %v1595_v58  ;;  %v1549_v8 = vsel %vm1404_vm4, %v3862_v11, 0.0  ;;  %v2026_v16 = vsel %vm1881_vm3, %v3874_v1, 0.0  ;;  %vm1882_vm7 = vcmp.eq.s32.totalorder %v1357_v14, 2 }
 0x184   :  { %v2550_v32 = vadd.f32 %v2503_v27, %v2311_v4  ;;  %v1596_v36 = vadd.f32 %v1549_v8, %v4349_v34  ;;  %vm2359_vm8 = vcmp.eq.s32.totalorder %v1350_v19, 4  ;;  %v1788_v47 = vsel %vm1643_vm5, %v3870_v55, 0.0 }
 0x185   :  { %v2073_v50 = vadd.f32 %v2026_v16, %v1834_v41  ;;  %v18_v20 = vstv %s4340_s12  ;;  %v2265_v45 = vsel %vm2120_vm6, %v3877_v40, 0.0  ;;  %vm2121_vm9 = vcmp.eq.s32.totalorder %v1357_v14, 3  ;;  %s4199_s12 = smov 0  }
 0x186   :  { %2597 = vst [vmem:[#allocation2 + $0x58] sm:$0x3] %v2550_v32  ;;  %v1835_v29 = vadd.f32 %v1788_v47, %v1596_v36  ;;  %19 = vst [vmem:[#allocation4] sm:$0x1] %v18_v20  ;;  %v2027_v17 = vsel %vm1882_vm7, %v3874_v1, 0.0  ;;  %v2504_v2 = vsel %vm2359_vm8, %v3880_v42, 0.0 }
 0x187   :  { %v2312_v11 = vadd.f32 %v2265_v45, %v2073_v50  ;;  %vm2360_vm10 = vcmp.eq.s32.totalorder %v1357_v14, 4  ;;  %v2266_v55 = vsel %vm2121_vm9, %v3877_v40, 0.0  ;;  %v3252_v15 = vmov 0.0  }
 0x188   :  { %v2074_v54 = vadd.f32 %v2027_v17, %v1835_v29  ;;  %v2505_v38 = vsel %vm2360_vm10, %v3880_v42, 0.0  ;;  %v3256_v6 = vmov 0.0  }
 0x189   :  { %v2551_v28 = vadd.f32 %v2504_v2, %v2312_v11 }
 0x18a   :  { %v2313_v0 = vadd.f32 %v2266_v55, %v2074_v54 }
 0x18b   :  { %2598 = vst [vmem:[#allocation2 + $0x5a] sm:$0x3] %v2551_v28 }
 0x18c   :  { %v2552_v57 = vadd.f32 %v2505_v38, %v2313_v0 }
 0x18e   :  { %2599 = vst [vmem:[#allocation2 + $0x5c] sm:$0x3] %v2552_v57 }
 0x18f LB: > { %v3277_v1 = vmov 0.0   ;;  %vm3278_vm11 = vmmov 0   ;;  %s3279_s17 = smov 32   ;;  %vm2618_vm12 = vcmask 261120   ;;  %s3072_s4 = sshll.u32 %s3262_s12, 1  ;;  %vm2721_vm13 = vcmask 254976   ;;  %s3262_s12 = sphi %s4199_s12, %s2609_s12   ;;  %v3258_v6 = vphi %v3256_v6, %v2715_v6   ;;  %v3254_v15 = vphi %v3252_v15, %v2709_v15  }
 0x190   : > { %3102 = vmatprep.subr.mxu0 %v3277_v1  ;;  %3110 = vmatprep.mubr.msk.f32.mxu0 %vm3278_vm11, %v3277_v1  ;;  %s2613_s18 = scalar_lea.vmem [#allocation2], %s3072_s4  ;;  %s3280_s19 = smov 64  }
 0x191   : > { %2616 = vrot.lane.b32.xlu0 %v3258_v6, %s3279_s17  ;;  %3103 = vmatpush3.msra.mxu0 %v3999_v26  ;;  %s2720_s20 = scalar_lea.vmem [#allocation3], %s3072_s4  ;;  %s2609_s12 = sadd.s32 1, %s3262_s12  }
 0x192   : > { %3104 = vmatprep.subr.mxu0 %v3277_v1  ;;  %p2606_p0 = scmp.ge.s32.totalorder %s2609_s12, 47  }
 0x193   : > { %3105 = vmatpush3.msra.mxu0 %v3991_v53  ;;  %v4224_v51 = vld [vmem:[%s4333_s6] sm:$0xff] (%p2606_p0)  ;;  %v4229_v56 = vld [vmem:[%s4333_s6 + $0x8] sm:$0xff] (%p2606_p0)  ;;  %v4234_v19 = vld [vmem:[%s4333_s6 + $0x10] sm:$0xff] (%p2606_p0)  ;;  %v4266_v12 = vmov (%p2606_p0), 0.0   ;;  %v4268_v21 = vmov (%p2606_p0), 0.0   ;;  %s4270_s16 = smov (%p2606_p0), 0  }
 0x194   : > { %3106 = vmatprep.subr.mxu0 %v3277_v1  ;;  %v4239_v37 = vld [vmem:[%s4333_s6 + $0x18] sm:$0xff] (%p2606_p0)  ;;  %v4254_v53 = vld [vmem:[%s4334_s7 + $0x10] sm:$0xff] (%p2606_p0)  ;;  %v4264_v33 = vld [vmem:[%s4335_s8] ss:$0 sm:$0xff] (%p2606_p0) }
 0x195   : > { %3107 = vmatpush3.msra.mxu0 %v3986_v23  ;;  %v2614_v42 = vld [vmem:[%s2613_s18] sm:$0x3]  ;;  %v4249_v23 = vld [vmem:[%s4334_s7 + $0x8] sm:$0xff] (%p2606_p0)  ;;  %v4259_v26 = vld [vmem:[%s4334_s7 + $0x18] sm:$0xff] (%p2606_p0) }
 0x196   : > { %3108 = vmatprep.subr.mxu0 %v3277_v1 }
 0x197   : > { %3109 = vmatpush3.msra.mxu0 %v3981_v3  ;;  %v4244_v3 = vld [vmem:[%s4334_s7] sm:$0xff] (%p2606_p0) }
 0x203   : > { %v2617_v40 = vpop.permute.xlu0 %2616 }
 0x204   : > { %3111 = vmatmul.mubr.msk.f32.vlgmr.msra.gmra.mxu0 %vm2618_vm12, %v2617_v40 }
 0x2c4   : > { %v2687_v46 = vpop.f32.mrf.mxu0 }
 0x2c5   : > { %v2691_v18 = vadd.f32 %v2687_v46, %v2614_v42 }
 0x2c6   : > { %v3112_v44 = vpop.f32.mrf.mxu0 }
 0x2c7   : > { %3212 = vtanh.f32 %v2691_v18  ;;  %v2692_v61 = vsub.f32 0.0, %v2691_v18 }
 0x2c9   : > { %v2693_v59 = vmul.f32 1.442695, %v2692_v61 }
 0x2cb   : > { %3214 = vpow2.f32 %v2693_v59 }
 0x2d4   : > { %v3213_v9 = vpop.eup %3212 }
 0x2d5   : > { %2701 = vrot.lane.b32.xlu0 %v3213_v9, %s3280_s19 }
 0x2d8   : > { %v3215_v43 = vpop.eup %3214 }
 0x2d9   : > { %v2695_v60 = vadd.f32 1.0, %v3215_v43 }
 0x2db   : > { %3216 = vrcp.f32 %v2695_v60 }
 0x2e8   : > { %v3217_v5 = vpop.eup %3216 }
 0x2e9   : > { %v2699_v7 = vmul.f32 %v3254_v15, %v3217_v5 }
 0x347   : > { %v2702_v22 = vpop.permute.xlu0 %2701 }
 0x348   : > { %v2704_v49 = vmul.f32 %v3217_v5, %v2702_v22 }
 0x34a   : > { %2706 = vrot.lane.b32.xlu1 %v2704_v49, %s3279_s17 }
 0x3bc   : > { %v2707_v39 = vpop.permute.xlu1 %2706 }
 0x3bd   : > { %v2709_v15 = vadd.f32 %v2707_v39, %v2699_v7  }
 0x3bf   : > { %3218 = vtanh.f32 %v2709_v15 }
 0x3cc   : > { %v3219_v30 = vpop.eup %3218 }
 0x3cd   : > { %2712 = vrot.lane.b32.xlu1 %v3219_v30, %s3280_s19 }
 0x43f   : > { %v2713_v13 = vpop.permute.xlu1 %2712 }
 0x440   : > { %v2715_v6 = vmul.f32 %v3217_v5, %v2713_v13  }
 0x442   : > { %2717 = vrot.lane.b32.xlu0 %v2715_v6, %s3279_s17 }
 0x4b1   :  { %2608 = sbr.rel (!%p2606_p0) target bundleno = 399 (0x18f), region = 89 }
 0x4b4   : > { %v2718_v35 = vpop.permute.xlu0 %2717 }
 0x4b5   : > { %2722 = vst.msk [vmem:[%s2720_s20] sm:$0x3] %vm2721_vm13, %v2718_v35 }
 0x4b6 LB: > { %v3281_v24 = vmov 0.0   ;;  %s3282_s7 = smov 32   ;;  %s3074_s8 = sshll.u32 %s3274_s16, 1  ;;  %vm3283_vm14 = vmmov 0   ;;  %s3274_s16 = sphi %s4270_s16, %s2737_s16   ;;  %v3270_v21 = vphi %v4268_v21, %v4350_v21   ;;  %v3266_v12 = vphi %v4266_v12, %v2916_v12  }
 0x4b7   : > { %3124 = vmatprep.subr.mxu1 %v3281_v24  ;;  %3113 = vmatprep.subr.mxu0 %v3281_v24  ;;  %s4284_s12 = scalar_lea.vmem [#allocation3], %s3074_s8  ;;  %s3284_s17 = smov 64  }
 0x4b8   : > { %2744 = vrot.lane.b32.xlu0 %v3270_v21, %s3282_s7  ;;  %3125 = vmatpush3.msra.mxu1 %v4239_v37  ;;  %s2737_s16 = sadd.s32 1, %s3274_s16  }
 0x4b9   : > { %3126 = vmatprep.subr.mxu1 %v3281_v24  ;;  %3114 = vmatpush3.msra.mxu0 %v4259_v26  ;;  %p2734_p1 = scmp.ge.s32.totalorder %s2737_s16, 47  }
 0x4ba   : > { %3127 = vmatpush3.msra.mxu1 %v4234_v19  ;;  %3115 = vmatprep.subr.mxu0 %v3281_v24  ;;  %v2932_v11 = vld [vmem:[%s4336_s9 + $0x18] sm:$0xff] (%p2734_p1)  ;;  %s3285_s19 = smov (%p2734_p1), 32   ;;  %v3286_v17 = vmov (%p2734_p1), 0.0   ;;  %v2931_v2 = vld [vmem:[%s4336_s9 + $0x10] sm:$0xff] (%p2734_p1)  ;;  %vm3287_vm15 = vmmov (%p2734_p1), 0   ;;  %v2930_v54 = vld [vmem:[%s4336_s9 + $0x8] sm:$0xff] (%p2734_p1) }
 0x4bb   : > { %3128 = vmatprep.subr.mxu1 %v3281_v24  ;;  %3116 = vmatpush3.msra.mxu0 %v4254_v53  ;;  %v2929_v28 = vld [vmem:[%s4336_s9] sm:$0xff] (%p2734_p1)  ;;  %v3081_v46 = vld [vmem:[#allocation4] ss:$0 sm:$0xff] (%p2734_p1)  ;;  %vm3037_vm0 = vcmask (%p2734_p1), 1024  }
 0x4bc   : > { %3129 = vmatpush3.msra.mxu1 %v4229_v56  ;;  %3117 = vmatprep.subr.mxu0 %v3281_v24  ;;  %v2742_v63 = vld [vmem:[%s4284_s12] sm:$0x3] }
 0x4bd   : > { %3130 = vmatprep.subr.mxu1 %v3281_v24  ;;  %3118 = vmatpush3.msra.mxu0 %v4249_v23  ;;  %v3078_v0 = vld [vmem:[%s4337_s10] ss:$0 sm:$0xff] (%p2734_p1) }
 0x4be   : > { %3131 = vmatpush3.msra.mxu1 %v4224_v51  ;;  %3132 = vmatprep.mubr.msk.f32.mxu1 %vm3283_vm14, %v3281_v24  ;;  %v3080_v6 = vld [vmem:[%s4338_s11] ss:$0 sm:$0xff] (%p2734_p1) }
 0x4bf   : > { %3119 = vmatprep.subr.mxu0 %v3281_v24  ;;  %3133 = vmatmul.mubr.msk.f32.vlgmr.msra.gmra.mxu1 %vm2618_vm12, %v2742_v63 }
 0x4c0   : > { %3120 = vmatpush3.msra.mxu0 %v4244_v3  ;;  %3121 = vmatprep.mubr.msk.f32.mxu0 %vm3283_vm14, %v3281_v24 }
 0x4c1   :  { %3135 = vmatprep.subr.mxu0 (%p2734_p1), %v3286_v17 }
 0x52a   : > { %v2745_v25 = vpop.permute.xlu0 %2744 }
 0x52b   : > { %3122 = vmatmul.mubr.msk.f32.vlgmr.msra.gmra.mxu0 %vm2618_vm12, %v2745_v25 }
 0x52c   :  { %3136 = vmatpush3.msra.mxu0 (%p2734_p1), %v2932_v11  ;;  %3143 = vmatprep.mubr.msk.f32.mxu0 (%p2734_p1), %vm3287_vm15, %v3286_v17 }
 0x52d   :  { %3137 = vmatprep.subr.mxu0 (%p2734_p1), %v3286_v17 }
 0x52e   :  { %3138 = vmatpush3.msra.mxu0 (%p2734_p1), %v2931_v2 }
 0x52f   :  { %3139 = vmatprep.subr.mxu0 (%p2734_p1), %v3286_v17 }
 0x530   :  { %3140 = vmatpush3.msra.mxu0 (%p2734_p1), %v2930_v54 }
 0x531   :  { %3141 = vmatprep.subr.mxu0 (%p2734_p1), %v3286_v17 }
 0x532   :  { %3142 = vmatpush3.msra.mxu0 (%p2734_p1), %v2929_v28 }
 0x57f   : > { %v2888_v14 = vpop.f32.mrf.mxu1 }
 0x581   : > { %v3134_v62 = vpop.f32.mrf.mxu1 }
 0x5eb   : > { %v2815_v52 = vpop.f32.mrf.mxu0 }
 0x5ec   : > { %v2889_v48 = vadd.f32 %v2888_v14, %v2815_v52 }
 0x5ed   : > { %v3123_v31 = vpop.f32.mrf.mxu0 }
 0x5ee   : > { %v2898_v58 = vadd.f32 %v4264_v33, %v2889_v48 }
 0x5f0   : > { %3220 = vtanh.f32 %v2898_v58  ;;  %v2899_v10 = vsub.f32 0.0, %v2898_v58 }
 0x5f2   : > { %v2900_v27 = vmul.f32 1.442695, %v2899_v10 }
 0x5f4   : > { %3222 = vpow2.f32 %v2900_v27 }
 0x5fd   : > { %v3221_v4 = vpop.eup %3220 }
 0x5fe   : > { %2908 = vrot.lane.b32.xlu0 %v3221_v4, %s3284_s17 }
 0x601   : > { %v3223_v41 = vpop.eup %3222 }
 0x602   : > { %v2902_v8 = vadd.f32 1.0, %v3223_v41 }
 0x604   : > { %3224 = vrcp.f32 %v2902_v8 }
 0x611   : > { %v3225_v32 = vpop.eup %3224 }
 0x612   : > { %v2906_v36 = vmul.f32 %v3266_v12, %v3225_v32 }
 0x670   : > { %v2909_v16 = vpop.permute.xlu0 %2908 }
 0x671   : > { %v2911_v34 = vmul.f32 %v3225_v32, %v2909_v16 }
 0x673   : > { %2913 = vrot.lane.b32.xlu1 %v2911_v34, %s3282_s7 }
 0x6e5   : > { %v2914_v50 = vpop.permute.xlu1 %2913 }
 0x6e6   : > { %v2916_v12 = vadd.f32 %v2914_v50, %v2906_v36  }
 0x6e8   : > { %3226 = vtanh.f32 %v2916_v12 }
 0x6f5   : > { %v3227_v47 = vpop.eup %3226 }
 0x6f6   : > { %2919 = vrot.lane.b32.xlu1 %v3227_v47, %s3284_s17 }
 0x768   : > { %v2920_v20 = vpop.permute.xlu1 %2919 }
 0x769   : > { %v2922_v45 = vmul.f32 %v3225_v32, %v2920_v20  }
 0x76b   : > { %2924 = vrot.lane.b32.xlu0 %v2922_v45, %s3282_s7  ;;  %v4350_v21 = vmov %v2922_v45 }
 0x76f   :  { %2941 = vrot.lane.b32.xlu0 (%p2734_p1), %v2922_v45, %s3285_s19 }
 0x7da   :  { %2736 = sbr.rel (!%p2734_p1) target bundleno = 1206 (0x4b6), region = 100 }
 0x7dd   : > { %v2925_v29 = vpop.permute.xlu0 %2924 }
 0x7de   : > { %2928 = vst.msk [vmem:[%s4284_s12] sm:$0x3] %vm2721_vm13, %v2925_v29 }
 0x7e1   :  { %v2942_v55 = vpop.permute.xlu0 %2941 }
 0x7e2   :  { %3144 = vmatmul.mubr.msk.f32.vlgmr.msra.gmra.mxu0 %vm2618_vm12, %v2942_v55 }
 0x8a2   :  { %v3012_v38 = vpop.f32.mrf.mxu0 }
 0x8a3   :  { %v3013_v57 = vadd.f32 %v3078_v0, %v3012_v38 }
 0x8a4   :  { %v3145_v15 = vpop.f32.mrf.mxu0 }
 0x8a5   :  { %v3016_v1 = vmax.f32 %v3013_v57, 0.0 }
 0x8a7   :  { %v3024_v40 = vmul.f32 %v3080_v6, %v3016_v1 }
 0x8a9   :  { %v3026_v42 = vsel %vm2721_vm13, %v3024_v40, 0.0 }
 0x8aa   :  { %3027 = vadd.xlane.f32.xlu0 %v3026_v42 }
 0x933   :  { %v3028_v18 = vpop.xlane.xlu0 %3027 }
 0x934   :  { %v3036_v44 = vadd.f32 %v3081_v46, %v3028_v18 }
 0x936   :  { %3038 = vst.msk [vmem:[%s4339_s13] sm:$0x3] %vm3037_vm0, %v3036_v44 }

</bundles_post_ra>
